<compile_context>
chip_gen: v6e
topology: v6e:2x2x1
jax: 0.10.0
libtpu: 0.0.40
codegen_flags: <defaults>
</compile_context>

<pallas_src>
import jax
import jax.numpy as jnp
from jax.experimental import pallas as pl
from jax.experimental.pallas import tpu as pltpu


def make_zloc_kernel(num_layers, T, B, D, H):
    """Builds kernel: x(T,B,D), {w_ih,w_hh,b}*L, (w,b)*4 -> (B, OUT_PAD)."""

    def kernel(*refs):
        x_ref = refs[0]                                    # (T, B, D)
        lstm_refs = refs[1:1 + 3 * num_layers]
        mlp_refs = refs[1 + 3 * num_layers:1 + 3 * num_layers + 8]
        out_ref = refs[-2]                                 # (B, OUT_PAD)
        seq_ref = refs[-1]                                 # (T, B, H) VMEM scratch

        h_last = None
        for l in range(num_layers):
            w_ih = lstm_refs[3 * l][...]                   # (D_in, 4H)
            w_hh = lstm_refs[3 * l + 1][...]               # (H, 4H)
            b = lstm_refs[3 * l + 2][...]                  # (1, 4H)

            # ---- Hoisted input projection: one MXU pass over all timesteps.
            if l == 0:
                x_all = x_ref[...].reshape(T * B, D)
            else:
                x_all = seq_ref[...].reshape(T * B, H)     # prev layer's sequence
            gates_in = (jnp.dot(x_all, w_ih, preferred_element_type=jnp.float32)
                        + b)                               # (T*B, 4H), bias folded once

            store_seq = l < num_layers - 1                 # top layer's seq never read

            # ---- Serial recurrence, statically unrolled (T small & static).
            h = jnp.zeros((B, H), jnp.float32)
            c = jnp.zeros((B, H), jnp.float32)
            for t in range(T):
                gates = (gates_in[t * B:(t + 1) * B, :]
                         + jnp.dot(h, w_hh, preferred_element_type=jnp.float32))
                i = jax.nn.sigmoid(gates[:, 0 * H:1 * H])
                f = jax.nn.sigmoid(gates[:, 1 * H:2 * H])
                g = jnp.tanh(gates[:, 2 * H:3 * H])
                o = jax.nn.sigmoid(gates[:, 3 * H:4 * H])
                c = f * c + i * g
                h = o * jnp.tanh(c)
                if store_seq:
                    seq_ref[t] = h                         # static-index store
            h_last = h

        # ---- fc head on out[:, -1] (widths lane-padded; padding is exact zeros).
        w1, b1, w2, b2, w3, b3, w4, b4 = [r[...] for r in mlp_refs]
        z = h_last
        z = jnp.maximum(jnp.dot(z, w1, preferred_element_type=jnp.float32) + b1, 0.0)
        z = jnp.maximum(jnp.dot(z, w2, preferred_element_type=jnp.float32) + b2, 0.0)
        z = jnp.maximum(jnp.dot(z, w3, preferred_element_type=jnp.float32) + b3, 0.0)
        out_ref[...] = jnp.dot(z, w4, preferred_element_type=jnp.float32) + b4

    return kernel


def _pad2d(x, rows=None, cols=None):
    r, c = x.shape
    pr = 0 if rows is None else rows - r
    pc = 0 if cols is None else cols - c
    if pr == 0 and pc == 0:
        return x
    return jnp.pad(x, ((0, pr), (0, pc)))


def zloc_forward(x, params):
    """x: (B, T, input_dim) float32 -> (B, output_dim) float32."""
    B, T, D = x.shape
    H = params["hidden_dim"]
    L = params["num_layers"]
    out_dim = params["fc"][-1][0].shape[1]

    def rup(n, m):
        return ((n + m - 1) // m) * m

    B_pad = rup(B, 8)            # sublane-dense batch
    out_pad = rup(out_dim, 128)  # lane-dense final store

    # time-major, zero-pad batch rows (sliced off after the call)
    x_tbd = jnp.transpose(x, (1, 0, 2)).astype(jnp.float32)
    if B_pad != B:
        x_tbd = jnp.pad(x_tbd, ((0, 0), (0, B_pad - B), (0, 0)))

    inputs = [x_tbd]
    for l in range(L):
        lp = params["lstm"][l]
        inputs += [lp["w_ih"], lp["w_hh"], lp["b"]]

    # Lane-pad MLP widths to multiples of 128 (exact through ReLU: padded
    # biases are 0, padded weight rows/cols are 0).
    fc = params["fc"]
    widths = [rup(w.shape[1], 128) for (w, _) in fc]
    prev_pad = None
    for idx, (w, b) in enumerate(fc):
        inputs += [_pad2d(w, rows=prev_pad, cols=widths[idx]),
                   _pad2d(b, cols=widths[idx])]
        prev_pad = widths[idx]

    # TODO(synk): for large B, add a leading batch grid with
    # dimension_semantics=("parallel",) to use v7x's second TensorCore.
    kernel = make_zloc_kernel(L, T, B_pad, D, H)
    out = pl.pallas_call(
        kernel,
        out_shape=jax.ShapeDtypeStruct((B_pad, out_pad), jnp.float32),
        in_specs=[pl.BlockSpec(memory_space=pltpu.MemorySpace.VMEM)] * len(inputs),
        out_specs=pl.BlockSpec(memory_space=pltpu.MemorySpace.VMEM),
        scratch_shapes=[pltpu.VMEM((T, B_pad, H), jnp.float32)],
    )(*inputs)
    return out[:B, :out_dim]


def init_params(key, input_dim, hidden_dim, num_layers, output_dim=1):
    """Deterministic synthetic parameters matching nn.LSTM + fc stack shapes."""
    params = {"hidden_dim": hidden_dim, "num_layers": num_layers, "lstm": [], "fc": []}

    def u(k, shape, bound):
        return jax.random.uniform(k, shape, jnp.float32, -bound, bound)

    k = key
    std = float(1.0 / (hidden_dim ** 0.5))
    for l in range(num_layers):
        d_in = input_dim if l == 0 else hidden_dim
        k, k1, k2, k3, k4 = jax.random.split(k, 5)
        # Stored pre-transposed: PyTorch weight_ih_l{l} is (4H, d_in); we keep (d_in, 4H).
        w_ih = u(k1, (d_in, 4 * hidden_dim), std)
        w_hh = u(k2, (hidden_dim, 4 * hidden_dim), std)
        # bias_ih + bias_hh fused into one (1, 4H) bias.
        b = u(k3, (1, 4 * hidden_dim), std) + u(k4, (1, 4 * hidden_dim), std)
        params["lstm"].append({"w_ih": w_ih, "w_hh": w_hh, "b": b})

    sizes = [hidden_dim, 306, 154, 76, output_dim]
    for i in range(len(sizes) - 1):
        k, k1, k2 = jax.random.split(k, 3)
        bound = float(1.0 / (sizes[i] ** 0.5))
        w = u(k1, (sizes[i], sizes[i + 1]), bound)   # (in, out) == Linear.weight.T
        b = u(k2, (1, sizes[i + 1]), bound)
        params["fc"].append((w, b))
    return params


if __name__ == "__main__":
    B, T, D, H, L = 2, 8, 4, 32, 2     # batch, seq, input_dim, hidden_dim, layer_dim
    key = jax.random.PRNGKey(0)
    kx, kp = jax.random.split(key)

    x = jax.random.normal(kx, (B, T, D), dtype=jnp.float32)
    params = init_params(kp, D, H, L, output_dim=1)

    out = zloc_forward(x, params)
    out = jax.block_until_ready(out)
    assert out.shape == (B, 1) and bool(jnp.all(jnp.isfinite(out)))
    print("KERNEL_OK")
</pallas_src>

<mosaic_0001>
module attributes {stable_mosaic.version = 11 : i64} {
  func.func @kernel(%arg0: memref<8x8x4xf32, #tpu.memory_space<vmem>>, %arg1: memref<4x128xf32, #tpu.memory_space<vmem>>, %arg2: memref<32x128xf32, #tpu.memory_space<vmem>>, %arg3: memref<1x128xf32, #tpu.memory_space<vmem>>, %arg4: memref<32x128xf32, #tpu.memory_space<vmem>>, %arg5: memref<32x128xf32, #tpu.memory_space<vmem>>, %arg6: memref<1x128xf32, #tpu.memory_space<vmem>>, %arg7: memref<32x384xf32, #tpu.memory_space<vmem>>, %arg8: memref<1x384xf32, #tpu.memory_space<vmem>>, %arg9: memref<384x256xf32, #tpu.memory_space<vmem>>, %arg10: memref<1x256xf32, #tpu.memory_space<vmem>>, %arg11: memref<256x128xf32, #tpu.memory_space<vmem>>, %arg12: memref<1x128xf32, #tpu.memory_space<vmem>>, %arg13: memref<128x128xf32, #tpu.memory_space<vmem>>, %arg14: memref<1x128xf32, #tpu.memory_space<vmem>>, %arg15: memref<8x128xf32, #tpu.memory_space<vmem>>, %arg16: memref<8x8x32xf32, #tpu.memory_space<vmem>>) attributes {dimension_semantics = [], scalar_prefetch = 0 : i64, scratch_operands = 1 : i64, tpu.core_type = #tpu.core_type<tc>} {
    %c0 = arith.constant 0 : index
    %c0_0 = arith.constant 0 : index
    %0 = vector.load %arg1[%c0, %c0_0] : memref<4x128xf32, #tpu.memory_space<vmem>>, vector<4x128xf32>
    %c0_1 = arith.constant 0 : index
    %c0_2 = arith.constant 0 : index
    %1 = vector.load %arg2[%c0_1, %c0_2] : memref<32x128xf32, #tpu.memory_space<vmem>>, vector<32x128xf32>
    %c0_3 = arith.constant 0 : index
    %c0_4 = arith.constant 0 : index
    %2 = vector.load %arg3[%c0_3, %c0_4] : memref<1x128xf32, #tpu.memory_space<vmem>>, vector<1x128xf32>
    %c0_5 = arith.constant 0 : index
    %c0_6 = arith.constant 0 : index
    %c0_7 = arith.constant 0 : index
    %3 = vector.load %arg0[%c0_5, %c0_6, %c0_7] : memref<8x8x4xf32, #tpu.memory_space<vmem>>, vector<8x8x4xf32>
    %4 = vector.shape_cast %3 : vector<8x8x4xf32> to vector<64x4xf32>
    %cst = arith.constant dense<0.000000e+00> : vector<64x128xf32>
    %5 = tpu.matmul %4, %0, %cst {dimension_numbers = #tpu.dot_dimension_numbers<[1], [0], [0], [1], [0, 0, 1, 1], [], []>} : vector<64x4xf32>, vector<4x128xf32>, vector<64x128xf32> -> vector<64x128xf32>
    %6 = vector.broadcast %2 : vector<1x128xf32> to vector<64x128xf32>
    %7 = arith.addf %5, %6 : vector<64x128xf32>
    %cst_8 = arith.constant 0.000000e+00 : f32
    %8 = vector.broadcast %cst_8 : f32 to vector<8x32xf32>
    %cst_9 = arith.constant 0.000000e+00 : f32
    %9 = vector.broadcast %cst_9 : f32 to vector<8x32xf32>
    %10 = vector.extract_strided_slice %7 {offsets = [0, 0], sizes = [8, 128], strides = [1, 1]} : vector<64x128xf32> to vector<8x128xf32>
    %cst_10 = arith.constant dense<0.000000e+00> : vector<8x128xf32>
    %11 = tpu.matmul %8, %1, %cst_10 {dimension_numbers = #tpu.dot_dimension_numbers<[1], [0], [0], [1], [0, 0, 1, 1], [], []>} : vector<8x32xf32>, vector<32x128xf32>, vector<8x128xf32> -> vector<8x128xf32>
    %12 = arith.addf %10, %11 : vector<8x128xf32>
    %13 = vector.extract_strided_slice %12 {offsets = [0, 0], sizes = [8, 32], strides = [1, 1]} : vector<8x128xf32> to vector<8x32xf32>
    %14 = arith.negf %13 : vector<8x32xf32>
    %15 = math.exp %14 : vector<8x32xf32>
    %cst_11 = arith.constant 1.000000e+00 : f32
    %16 = vector.broadcast %cst_11 : f32 to vector<8x32xf32>
    %17 = arith.addf %16, %15 : vector<8x32xf32>
    %18 = arith.divf %16, %17 : vector<8x32xf32>
    %19 = vector.extract_strided_slice %12 {offsets = [0, 32], sizes = [8, 32], strides = [1, 1]} : vector<8x128xf32> to vector<8x32xf32>
    %20 = arith.negf %19 : vector<8x32xf32>
    %21 = math.exp %20 : vector<8x32xf32>
    %cst_12 = arith.constant 1.000000e+00 : f32
    %22 = vector.broadcast %cst_12 : f32 to vector<8x32xf32>
    %23 = arith.addf %22, %21 : vector<8x32xf32>
    %24 = arith.divf %22, %23 : vector<8x32xf32>
    %25 = vector.extract_strided_slice %12 {offsets = [0, 64], sizes = [8, 32], strides = [1, 1]} : vector<8x128xf32> to vector<8x32xf32>
    %26 = math.tanh %25 : vector<8x32xf32>
    %27 = vector.extract_strided_slice %12 {offsets = [0, 96], sizes = [8, 32], strides = [1, 1]} : vector<8x128xf32> to vector<8x32xf32>
    %28 = arith.negf %27 : vector<8x32xf32>
    %29 = math.exp %28 : vector<8x32xf32>
    %cst_13 = arith.constant 1.000000e+00 : f32
    %30 = vector.broadcast %cst_13 : f32 to vector<8x32xf32>
    %31 = arith.addf %30, %29 : vector<8x32xf32>
    %32 = arith.divf %30, %31 : vector<8x32xf32>
    %33 = arith.mulf %24, %9 : vector<8x32xf32>
    %34 = arith.mulf %18, %26 : vector<8x32xf32>
    %35 = arith.addf %33, %34 : vector<8x32xf32>
    %36 = math.tanh %35 : vector<8x32xf32>
    %37 = arith.mulf %32, %36 : vector<8x32xf32>
    %c0_14 = arith.constant 0 : index
    %c0_15 = arith.constant 0 : index
    %c0_16 = arith.constant 0 : index
    %38 = vector.load %arg16[%c0_14, %c0_15, %c0_16] : memref<8x8x32xf32, #tpu.memory_space<vmem>>, vector<1x8x32xf32>
    %39 = vector.shape_cast %38 : vector<1x8x32xf32> to vector<8x32xf32>
    %40 = vector.shape_cast %37 : vector<8x32xf32> to vector<1x8x32xf32>
    tpu.vector_store %arg16[%c0_14, %c0_15, %c0_16], %40 {strides = array<i32>} : memref<8x8x32xf32, #tpu.memory_space<vmem>>, vector<1x8x32xf32>,
    %41 = vector.extract_strided_slice %7 {offsets = [8, 0], sizes = [8, 128], strides = [1, 1]} : vector<64x128xf32> to vector<8x128xf32>
    %cst_17 = arith.constant dense<0.000000e+00> : vector<8x128xf32>
    %42 = tpu.matmul %37, %1, %cst_17 {dimension_numbers = #tpu.dot_dimension_numbers<[1], [0], [0], [1], [0, 0, 1, 1], [], []>} : vector<8x32xf32>, vector<32x128xf32>, vector<8x128xf32> -> vector<8x128xf32>
    %43 = arith.addf %41, %42 : vector<8x128xf32>
    %44 = vector.extract_strided_slice %43 {offsets = [0, 0], sizes = [8, 32], strides = [1, 1]} : vector<8x128xf32> to vector<8x32xf32>
    %45 = arith.negf %44 : vector<8x32xf32>
    %46 = math.exp %45 : vector<8x32xf32>
    %cst_18 = arith.constant 1.000000e+00 : f32
    %47 = vector.broadcast %cst_18 : f32 to vector<8x32xf32>
    %48 = arith.addf %47, %46 : vector<8x32xf32>
    %49 = arith.divf %47, %48 : vector<8x32xf32>
    %50 = vector.extract_strided_slice %43 {offsets = [0, 32], sizes = [8, 32], strides = [1, 1]} : vector<8x128xf32> to vector<8x32xf32>
    %51 = arith.negf %50 : vector<8x32xf32>
    %52 = math.exp %51 : vector<8x32xf32>
    %cst_19 = arith.constant 1.000000e+00 : f32
    %53 = vector.broadcast %cst_19 : f32 to vector<8x32xf32>
    %54 = arith.addf %53, %52 : vector<8x32xf32>
    %55 = arith.divf %53, %54 : vector<8x32xf32>
    %56 = vector.extract_strided_slice %43 {offsets = [0, 64], sizes = [8, 32], strides = [1, 1]} : vector<8x128xf32> to vector<8x32xf32>
    %57 = math.tanh %56 : vector<8x32xf32>
    %58 = vector.extract_strided_slice %43 {offsets = [0, 96], sizes = [8, 32], strides = [1, 1]} : vector<8x128xf32> to vector<8x32xf32>
    %59 = arith.negf %58 : vector<8x32xf32>
    %60 = math.exp %59 : vector<8x32xf32>
    %cst_20 = arith.constant 1.000000e+00 : f32
    %61 = vector.broadcast %cst_20 : f32 to vector<8x32xf32>
    %62 = arith.addf %61, %60 : vector<8x32xf32>
    %63 = arith.divf %61, %62 : vector<8x32xf32>
    %64 = arith.mulf %55, %35 : vector<8x32xf32>
    %65 = arith.mulf %49, %57 : vector<8x32xf32>
    %66 = arith.addf %64, %65 : vector<8x32xf32>
    %67 = math.tanh %66 : vector<8x32xf32>
    %68 = arith.mulf %63, %67 : vector<8x32xf32>
    %c1 = arith.constant 1 : index
    %c0_21 = arith.constant 0 : index
    %c0_22 = arith.constant 0 : index
    %69 = vector.load %arg16[%c1, %c0_21, %c0_22] : memref<8x8x32xf32, #tpu.memory_space<vmem>>, vector<1x8x32xf32>
    %70 = vector.shape_cast %69 : vector<1x8x32xf32> to vector<8x32xf32>
    %71 = vector.shape_cast %68 : vector<8x32xf32> to vector<1x8x32xf32>
    tpu.vector_store %arg16[%c1, %c0_21, %c0_22], %71 {strides = array<i32>} : memref<8x8x32xf32, #tpu.memory_space<vmem>>, vector<1x8x32xf32>,
    %72 = vector.extract_strided_slice %7 {offsets = [16, 0], sizes = [8, 128], strides = [1, 1]} : vector<64x128xf32> to vector<8x128xf32>
    %cst_23 = arith.constant dense<0.000000e+00> : vector<8x128xf32>
    %73 = tpu.matmul %68, %1, %cst_23 {dimension_numbers = #tpu.dot_dimension_numbers<[1], [0], [0], [1], [0, 0, 1, 1], [], []>} : vector<8x32xf32>, vector<32x128xf32>, vector<8x128xf32> -> vector<8x128xf32>
    %74 = arith.addf %72, %73 : vector<8x128xf32>
    %75 = vector.extract_strided_slice %74 {offsets = [0, 0], sizes = [8, 32], strides = [1, 1]} : vector<8x128xf32> to vector<8x32xf32>
    %76 = arith.negf %75 : vector<8x32xf32>
    %77 = math.exp %76 : vector<8x32xf32>
    %cst_24 = arith.constant 1.000000e+00 : f32
    %78 = vector.broadcast %cst_24 : f32 to vector<8x32xf32>
    %79 = arith.addf %78, %77 : vector<8x32xf32>
    %80 = arith.divf %78, %79 : vector<8x32xf32>
    %81 = vector.extract_strided_slice %74 {offsets = [0, 32], sizes = [8, 32], strides = [1, 1]} : vector<8x128xf32> to vector<8x32xf32>
    %82 = arith.negf %81 : vector<8x32xf32>
    %83 = math.exp %82 : vector<8x32xf32>
    %cst_25 = arith.constant 1.000000e+00 : f32
    %84 = vector.broadcast %cst_25 : f32 to vector<8x32xf32>
    %85 = arith.addf %84, %83 : vector<8x32xf32>
    %86 = arith.divf %84, %85 : vector<8x32xf32>
    %87 = vector.extract_strided_slice %74 {offsets = [0, 64], sizes = [8, 32], strides = [1, 1]} : vector<8x128xf32> to vector<8x32xf32>
    %88 = math.tanh %87 : vector<8x32xf32>
    %89 = vector.extract_strided_slice %74 {offsets = [0, 96], sizes = [8, 32], strides = [1, 1]} : vector<8x128xf32> to vector<8x32xf32>
    %90 = arith.negf %89 : vector<8x32xf32>
    %91 = math.exp %90 : vector<8x32xf32>
    %cst_26 = arith.constant 1.000000e+00 : f32
    %92 = vector.broadcast %cst_26 : f32 to vector<8x32xf32>
    %93 = arith.addf %92, %91 : vector<8x32xf32>
    %94 = arith.divf %92, %93 : vector<8x32xf32>
    %95 = arith.mulf %86, %66 : vector<8x32xf32>
    %96 = arith.mulf %80, %88 : vector<8x32xf32>
    %97 = arith.addf %95, %96 : vector<8x32xf32>
    %98 = math.tanh %97 : vector<8x32xf32>
    %99 = arith.mulf %94, %98 : vector<8x32xf32>
    %c2 = arith.constant 2 : index
    %c0_27 = arith.constant 0 : index
    %c0_28 = arith.constant 0 : index
    %100 = vector.load %arg16[%c2, %c0_27, %c0_28] : memref<8x8x32xf32, #tpu.memory_space<vmem>>, vector<1x8x32xf32>
    %101 = vector.shape_cast %100 : vector<1x8x32xf32> to vector<8x32xf32>
    %102 = vector.shape_cast %99 : vector<8x32xf32> to vector<1x8x32xf32>
    tpu.vector_store %arg16[%c2, %c0_27, %c0_28], %102 {strides = array<i32>} : memref<8x8x32xf32, #tpu.memory_space<vmem>>, vector<1x8x32xf32>,
    %103 = vector.extract_strided_slice %7 {offsets = [24, 0], sizes = [8, 128], strides = [1, 1]} : vector<64x128xf32> to vector<8x128xf32>
    %cst_29 = arith.constant dense<0.000000e+00> : vector<8x128xf32>
    %104 = tpu.matmul %99, %1, %cst_29 {dimension_numbers = #tpu.dot_dimension_numbers<[1], [0], [0], [1], [0, 0, 1, 1], [], []>} : vector<8x32xf32>, vector<32x128xf32>, vector<8x128xf32> -> vector<8x128xf32>
    %105 = arith.addf %103, %104 : vector<8x128xf32>
    %106 = vector.extract_strided_slice %105 {offsets = [0, 0], sizes = [8, 32], strides = [1, 1]} : vector<8x128xf32> to vector<8x32xf32>
    %107 = arith.negf %106 : vector<8x32xf32>
    %108 = math.exp %107 : vector<8x32xf32>
    %cst_30 = arith.constant 1.000000e+00 : f32
    %109 = vector.broadcast %cst_30 : f32 to vector<8x32xf32>
    %110 = arith.addf %109, %108 : vector<8x32xf32>
    %111 = arith.divf %109, %110 : vector<8x32xf32>
    %112 = vector.extract_strided_slice %105 {offsets = [0, 32], sizes = [8, 32], strides = [1, 1]} : vector<8x128xf32> to vector<8x32xf32>
    %113 = arith.negf %112 : vector<8x32xf32>
    %114 = math.exp %113 : vector<8x32xf32>
    %cst_31 = arith.constant 1.000000e+00 : f32
    %115 = vector.broadcast %cst_31 : f32 to vector<8x32xf32>
    %116 = arith.addf %115, %114 : vector<8x32xf32>
    %117 = arith.divf %115, %116 : vector<8x32xf32>
    %118 = vector.extract_strided_slice %105 {offsets = [0, 64], sizes = [8, 32], strides = [1, 1]} : vector<8x128xf32> to vector<8x32xf32>
    %119 = math.tanh %118 : vector<8x32xf32>
    %120 = vector.extract_strided_slice %105 {offsets = [0, 96], sizes = [8, 32], strides = [1, 1]} : vector<8x128xf32> to vector<8x32xf32>
    %121 = arith.negf %120 : vector<8x32xf32>
    %122 = math.exp %121 : vector<8x32xf32>
    %cst_32 = arith.constant 1.000000e+00 : f32
    %123 = vector.broadcast %cst_32 : f32 to vector<8x32xf32>
    %124 = arith.addf %123, %122 : vector<8x32xf32>
    %125 = arith.divf %123, %124 : vector<8x32xf32>
    %126 = arith.mulf %117, %97 : vector<8x32xf32>
    %127 = arith.mulf %111, %119 : vector<8x32xf32>
    %128 = arith.addf %126, %127 : vector<8x32xf32>
    %129 = math.tanh %128 : vector<8x32xf32>
    %130 = arith.mulf %125, %129 : vector<8x32xf32>
    %c3 = arith.constant 3 : index
    %c0_33 = arith.constant 0 : index
    %c0_34 = arith.constant 0 : index
    %131 = vector.load %arg16[%c3, %c0_33, %c0_34] : memref<8x8x32xf32, #tpu.memory_space<vmem>>, vector<1x8x32xf32>
    %132 = vector.shape_cast %131 : vector<1x8x32xf32> to vector<8x32xf32>
    %133 = vector.shape_cast %130 : vector<8x32xf32> to vector<1x8x32xf32>
    tpu.vector_store %arg16[%c3, %c0_33, %c0_34], %133 {strides = array<i32>} : memref<8x8x32xf32, #tpu.memory_space<vmem>>, vector<1x8x32xf32>,
    %134 = vector.extract_strided_slice %7 {offsets = [32, 0], sizes = [8, 128], strides = [1, 1]} : vector<64x128xf32> to vector<8x128xf32>
    %cst_35 = arith.constant dense<0.000000e+00> : vector<8x128xf32>
    %135 = tpu.matmul %130, %1, %cst_35 {dimension_numbers = #tpu.dot_dimension_numbers<[1], [0], [0], [1], [0, 0, 1, 1], [], []>} : vector<8x32xf32>, vector<32x128xf32>, vector<8x128xf32> -> vector<8x128xf32>
    %136 = arith.addf %134, %135 : vector<8x128xf32>
    %137 = vector.extract_strided_slice %136 {offsets = [0, 0], sizes = [8, 32], strides = [1, 1]} : vector<8x128xf32> to vector<8x32xf32>
    %138 = arith.negf %137 : vector<8x32xf32>
    %139 = math.exp %138 : vector<8x32xf32>
    %cst_36 = arith.constant 1.000000e+00 : f32
    %140 = vector.broadcast %cst_36 : f32 to vector<8x32xf32>
    %141 = arith.addf %140, %139 : vector<8x32xf32>
    %142 = arith.divf %140, %141 : vector<8x32xf32>
    %143 = vector.extract_strided_slice %136 {offsets = [0, 32], sizes = [8, 32], strides = [1, 1]} : vector<8x128xf32> to vector<8x32xf32>
    %144 = arith.negf %143 : vector<8x32xf32>
    %145 = math.exp %144 : vector<8x32xf32>
    %cst_37 = arith.constant 1.000000e+00 : f32
    %146 = vector.broadcast %cst_37 : f32 to vector<8x32xf32>
    %147 = arith.addf %146, %145 : vector<8x32xf32>
    %148 = arith.divf %146, %147 : vector<8x32xf32>
    %149 = vector.extract_strided_slice %136 {offsets = [0, 64], sizes = [8, 32], strides = [1, 1]} : vector<8x128xf32> to vector<8x32xf32>
    %150 = math.tanh %149 : vector<8x32xf32>
    %151 = vector.extract_strided_slice %136 {offsets = [0, 96], sizes = [8, 32], strides = [1, 1]} : vector<8x128xf32> to vector<8x32xf32>
    %152 = arith.negf %151 : vector<8x32xf32>
    %153 = math.exp %152 : vector<8x32xf32>
    %cst_38 = arith.constant 1.000000e+00 : f32
    %154 = vector.broadcast %cst_38 : f32 to vector<8x32xf32>
    %155 = arith.addf %154, %153 : vector<8x32xf32>
    %156 = arith.divf %154, %155 : vector<8x32xf32>
    %157 = arith.mulf %148, %128 : vector<8x32xf32>
    %158 = arith.mulf %142, %150 : vector<8x32xf32>
    %159 = arith.addf %157, %158 : vector<8x32xf32>
    %160 = math.tanh %159 : vector<8x32xf32>
    %161 = arith.mulf %156, %160 : vector<8x32xf32>
    %c4 = arith.constant 4 : index
    %c0_39 = arith.constant 0 : index
    %c0_40 = arith.constant 0 : index
    %162 = vector.load %arg16[%c4, %c0_39, %c0_40] : memref<8x8x32xf32, #tpu.memory_space<vmem>>, vector<1x8x32xf32>
    %163 = vector.shape_cast %162 : vector<1x8x32xf32> to vector<8x32xf32>
    %164 = vector.shape_cast %161 : vector<8x32xf32> to vector<1x8x32xf32>
    tpu.vector_store %arg16[%c4, %c0_39, %c0_40], %164 {strides = array<i32>} : memref<8x8x32xf32, #tpu.memory_space<vmem>>, vector<1x8x32xf32>,
    %165 = vector.extract_strided_slice %7 {offsets = [40, 0], sizes = [8, 128], strides = [1, 1]} : vector<64x128xf32> to vector<8x128xf32>
    %cst_41 = arith.constant dense<0.000000e+00> : vector<8x128xf32>
    %166 = tpu.matmul %161, %1, %cst_41 {dimension_numbers = #tpu.dot_dimension_numbers<[1], [0], [0], [1], [0, 0, 1, 1], [], []>} : vector<8x32xf32>, vector<32x128xf32>, vector<8x128xf32> -> vector<8x128xf32>
    %167 = arith.addf %165, %166 : vector<8x128xf32>
    %168 = vector.extract_strided_slice %167 {offsets = [0, 0], sizes = [8, 32], strides = [1, 1]} : vector<8x128xf32> to vector<8x32xf32>
    %169 = arith.negf %168 : vector<8x32xf32>
    %170 = math.exp %169 : vector<8x32xf32>
    %cst_42 = arith.constant 1.000000e+00 : f32
    %171 = vector.broadcast %cst_42 : f32 to vector<8x32xf32>
    %172 = arith.addf %171, %170 : vector<8x32xf32>
    %173 = arith.divf %171, %172 : vector<8x32xf32>
    %174 = vector.extract_strided_slice %167 {offsets = [0, 32], sizes = [8, 32], strides = [1, 1]} : vector<8x128xf32> to vector<8x32xf32>
    %175 = arith.negf %174 : vector<8x32xf32>
    %176 = math.exp %175 : vector<8x32xf32>
    %cst_43 = arith.constant 1.000000e+00 : f32
    %177 = vector.broadcast %cst_43 : f32 to vector<8x32xf32>
    %178 = arith.addf %177, %176 : vector<8x32xf32>
    %179 = arith.divf %177, %178 : vector<8x32xf32>
    %180 = vector.extract_strided_slice %167 {offsets = [0, 64], sizes = [8, 32], strides = [1, 1]} : vector<8x128xf32> to vector<8x32xf32>
    %181 = math.tanh %180 : vector<8x32xf32>
    %182 = vector.extract_strided_slice %167 {offsets = [0, 96], sizes = [8, 32], strides = [1, 1]} : vector<8x128xf32> to vector<8x32xf32>
    %183 = arith.negf %182 : vector<8x32xf32>
    %184 = math.exp %183 : vector<8x32xf32>
    %cst_44 = arith.constant 1.000000e+00 : f32
    %185 = vector.broadcast %cst_44 : f32 to vector<8x32xf32>
    %186 = arith.addf %185, %184 : vector<8x32xf32>
    %187 = arith.divf %185, %186 : vector<8x32xf32>
    %188 = arith.mulf %179, %159 : vector<8x32xf32>
    %189 = arith.mulf %173, %181 : vector<8x32xf32>
    %190 = arith.addf %188, %189 : vector<8x32xf32>
    %191 = math.tanh %190 : vector<8x32xf32>
    %192 = arith.mulf %187, %191 : vector<8x32xf32>
    %c5 = arith.constant 5 : index
    %c0_45 = arith.constant 0 : index
    %c0_46 = arith.constant 0 : index
    %193 = vector.load %arg16[%c5, %c0_45, %c0_46] : memref<8x8x32xf32, #tpu.memory_space<vmem>>, vector<1x8x32xf32>
    %194 = vector.shape_cast %193 : vector<1x8x32xf32> to vector<8x32xf32>
    %195 = vector.shape_cast %192 : vector<8x32xf32> to vector<1x8x32xf32>
    tpu.vector_store %arg16[%c5, %c0_45, %c0_46], %195 {strides = array<i32>} : memref<8x8x32xf32, #tpu.memory_space<vmem>>, vector<1x8x32xf32>,
    %196 = vector.extract_strided_slice %7 {offsets = [48, 0], sizes = [8, 128], strides = [1, 1]} : vector<64x128xf32> to vector<8x128xf32>
    %cst_47 = arith.constant dense<0.000000e+00> : vector<8x128xf32>
    %197 = tpu.matmul %192, %1, %cst_47 {dimension_numbers = #tpu.dot_dimension_numbers<[1], [0], [0], [1], [0, 0, 1, 1], [], []>} : vector<8x32xf32>, vector<32x128xf32>, vector<8x128xf32> -> vector<8x128xf32>
    %198 = arith.addf %196, %197 : vector<8x128xf32>
    %199 = vector.extract_strided_slice %198 {offsets = [0, 0], sizes = [8, 32], strides = [1, 1]} : vector<8x128xf32> to vector<8x32xf32>
    %200 = arith.negf %199 : vector<8x32xf32>
    %201 = math.exp %200 : vector<8x32xf32>
    %cst_48 = arith.constant 1.000000e+00 : f32
    %202 = vector.broadcast %cst_48 : f32 to vector<8x32xf32>
    %203 = arith.addf %202, %201 : vector<8x32xf32>
    %204 = arith.divf %202, %203 : vector<8x32xf32>
    %205 = vector.extract_strided_slice %198 {offsets = [0, 32], sizes = [8, 32], strides = [1, 1]} : vector<8x128xf32> to vector<8x32xf32>
    %206 = arith.negf %205 : vector<8x32xf32>
    %207 = math.exp %206 : vector<8x32xf32>
    %cst_49 = arith.constant 1.000000e+00 : f32
    %208 = vector.broadcast %cst_49 : f32 to vector<8x32xf32>
    %209 = arith.addf %208, %207 : vector<8x32xf32>
    %210 = arith.divf %208, %209 : vector<8x32xf32>
    %211 = vector.extract_strided_slice %198 {offsets = [0, 64], sizes = [8, 32], strides = [1, 1]} : vector<8x128xf32> to vector<8x32xf32>
    %212 = math.tanh %211 : vector<8x32xf32>
    %213 = vector.extract_strided_slice %198 {offsets = [0, 96], sizes = [8, 32], strides = [1, 1]} : vector<8x128xf32> to vector<8x32xf32>
    %214 = arith.negf %213 : vector<8x32xf32>
    %215 = math.exp %214 : vector<8x32xf32>
    %cst_50 = arith.constant 1.000000e+00 : f32
    %216 = vector.broadcast %cst_50 : f32 to vector<8x32xf32>
    %217 = arith.addf %216, %215 : vector<8x32xf32>
    %218 = arith.divf %216, %217 : vector<8x32xf32>
    %219 = arith.mulf %210, %190 : vector<8x32xf32>
    %220 = arith.mulf %204, %212 : vector<8x32xf32>
    %221 = arith.addf %219, %220 : vector<8x32xf32>
    %222 = math.tanh %221 : vector<8x32xf32>
    %223 = arith.mulf %218, %222 : vector<8x32xf32>
    %c6 = arith.constant 6 : index
    %c0_51 = arith.constant 0 : index
    %c0_52 = arith.constant 0 : index
    %224 = vector.load %arg16[%c6, %c0_51, %c0_52] : memref<8x8x32xf32, #tpu.memory_space<vmem>>, vector<1x8x32xf32>
    %225 = vector.shape_cast %224 : vector<1x8x32xf32> to vector<8x32xf32>
    %226 = vector.shape_cast %223 : vector<8x32xf32> to vector<1x8x32xf32>
    tpu.vector_store %arg16[%c6, %c0_51, %c0_52], %226 {strides = array<i32>} : memref<8x8x32xf32, #tpu.memory_space<vmem>>, vector<1x8x32xf32>,
    %227 = vector.extract_strided_slice %7 {offsets = [56, 0], sizes = [8, 128], strides = [1, 1]} : vector<64x128xf32> to vector<8x128xf32>
    %cst_53 = arith.constant dense<0.000000e+00> : vector<8x128xf32>
    %228 = tpu.matmul %223, %1, %cst_53 {dimension_numbers = #tpu.dot_dimension_numbers<[1], [0], [0], [1], [0, 0, 1, 1], [], []>} : vector<8x32xf32>, vector<32x128xf32>, vector<8x128xf32> -> vector<8x128xf32>
    %229 = arith.addf %227, %228 : vector<8x128xf32>
    %230 = vector.extract_strided_slice %229 {offsets = [0, 0], sizes = [8, 32], strides = [1, 1]} : vector<8x128xf32> to vector<8x32xf32>
    %231 = arith.negf %230 : vector<8x32xf32>
    %232 = math.exp %231 : vector<8x32xf32>
    %cst_54 = arith.constant 1.000000e+00 : f32
    %233 = vector.broadcast %cst_54 : f32 to vector<8x32xf32>
    %234 = arith.addf %233, %232 : vector<8x32xf32>
    %235 = arith.divf %233, %234 : vector<8x32xf32>
    %236 = vector.extract_strided_slice %229 {offsets = [0, 32], sizes = [8, 32], strides = [1, 1]} : vector<8x128xf32> to vector<8x32xf32>
    %237 = arith.negf %236 : vector<8x32xf32>
    %238 = math.exp %237 : vector<8x32xf32>
    %cst_55 = arith.constant 1.000000e+00 : f32
    %239 = vector.broadcast %cst_55 : f32 to vector<8x32xf32>
    %240 = arith.addf %239, %238 : vector<8x32xf32>
    %241 = arith.divf %239, %240 : vector<8x32xf32>
    %242 = vector.extract_strided_slice %229 {offsets = [0, 64], sizes = [8, 32], strides = [1, 1]} : vector<8x128xf32> to vector<8x32xf32>
    %243 = math.tanh %242 : vector<8x32xf32>
    %244 = vector.extract_strided_slice %229 {offsets = [0, 96], sizes = [8, 32], strides = [1, 1]} : vector<8x128xf32> to vector<8x32xf32>
    %245 = arith.negf %244 : vector<8x32xf32>
    %246 = math.exp %245 : vector<8x32xf32>
    %cst_56 = arith.constant 1.000000e+00 : f32
    %247 = vector.broadcast %cst_56 : f32 to vector<8x32xf32>
    %248 = arith.addf %247, %246 : vector<8x32xf32>
    %249 = arith.divf %247, %248 : vector<8x32xf32>
    %250 = arith.mulf %241, %221 : vector<8x32xf32>
    %251 = arith.mulf %235, %243 : vector<8x32xf32>
    %252 = arith.addf %250, %251 : vector<8x32xf32>
    %253 = math.tanh %252 : vector<8x32xf32>
    %254 = arith.mulf %249, %253 : vector<8x32xf32>
    %c7 = arith.constant 7 : index
    %c0_57 = arith.constant 0 : index
    %c0_58 = arith.constant 0 : index
    %255 = vector.load %arg16[%c7, %c0_57, %c0_58] : memref<8x8x32xf32, #tpu.memory_space<vmem>>, vector<1x8x32xf32>
    %256 = vector.shape_cast %255 : vector<1x8x32xf32> to vector<8x32xf32>
    %257 = vector.shape_cast %254 : vector<8x32xf32> to vector<1x8x32xf32>
    tpu.vector_store %arg16[%c7, %c0_57, %c0_58], %257 {strides = array<i32>} : memref<8x8x32xf32, #tpu.memory_space<vmem>>, vector<1x8x32xf32>,
    %c0_59 = arith.constant 0 : index
    %c0_60 = arith.constant 0 : index
    %258 = vector.load %arg4[%c0_59, %c0_60] : memref<32x128xf32, #tpu.memory_space<vmem>>, vector<32x128xf32>
    %c0_61 = arith.constant 0 : index
    %c0_62 = arith.constant 0 : index
    %259 = vector.load %arg5[%c0_61, %c0_62] : memref<32x128xf32, #tpu.memory_space<vmem>>, vector<32x128xf32>
    %c0_63 = arith.constant 0 : index
    %c0_64 = arith.constant 0 : index
    %260 = vector.load %arg6[%c0_63, %c0_64] : memref<1x128xf32, #tpu.memory_space<vmem>>, vector<1x128xf32>
    %c0_65 = arith.constant 0 : index
    %c0_66 = arith.constant 0 : index
    %c0_67 = arith.constant 0 : index
    %261 = vector.load %arg16[%c0_65, %c0_66, %c0_67] : memref<8x8x32xf32, #tpu.memory_space<vmem>>, vector<8x8x32xf32>
    %262 = vector.shape_cast %261 : vector<8x8x32xf32> to vector<64x32xf32>
    %cst_68 = arith.constant dense<0.000000e+00> : vector<64x128xf32>
    %263 = tpu.matmul %262, %258, %cst_68 {dimension_numbers = #tpu.dot_dimension_numbers<[1], [0], [0], [1], [0, 0, 1, 1], [], []>} : vector<64x32xf32>, vector<32x128xf32>, vector<64x128xf32> -> vector<64x128xf32>
    %264 = vector.broadcast %260 : vector<1x128xf32> to vector<64x128xf32>
    %265 = arith.addf %263, %264 : vector<64x128xf32>
    %cst_69 = arith.constant 0.000000e+00 : f32
    %266 = vector.broadcast %cst_69 : f32 to vector<8x32xf32>
    %cst_70 = arith.constant 0.000000e+00 : f32
    %267 = vector.broadcast %cst_70 : f32 to vector<8x32xf32>
    %268 = vector.extract_strided_slice %265 {offsets = [0, 0], sizes = [8, 128], strides = [1, 1]} : vector<64x128xf32> to vector<8x128xf32>
    %cst_71 = arith.constant dense<0.000000e+00> : vector<8x128xf32>
    %269 = tpu.matmul %266, %259, %cst_71 {dimension_numbers = #tpu.dot_dimension_numbers<[1], [0], [0], [1], [0, 0, 1, 1], [], []>} : vector<8x32xf32>, vector<32x128xf32>, vector<8x128xf32> -> vector<8x128xf32>
    %270 = arith.addf %268, %269 : vector<8x128xf32>
    %271 = vector.extract_strided_slice %270 {offsets = [0, 0], sizes = [8, 32], strides = [1, 1]} : vector<8x128xf32> to vector<8x32xf32>
    %272 = arith.negf %271 : vector<8x32xf32>
    %273 = math.exp %272 : vector<8x32xf32>
    %cst_72 = arith.constant 1.000000e+00 : f32
    %274 = vector.broadcast %cst_72 : f32 to vector<8x32xf32>
    %275 = arith.addf %274, %273 : vector<8x32xf32>
    %276 = arith.divf %274, %275 : vector<8x32xf32>
    %277 = vector.extract_strided_slice %270 {offsets = [0, 32], sizes = [8, 32], strides = [1, 1]} : vector<8x128xf32> to vector<8x32xf32>
    %278 = arith.negf %277 : vector<8x32xf32>
    %279 = math.exp %278 : vector<8x32xf32>
    %cst_73 = arith.constant 1.000000e+00 : f32
    %280 = vector.broadcast %cst_73 : f32 to vector<8x32xf32>
    %281 = arith.addf %280, %279 : vector<8x32xf32>
    %282 = arith.divf %280, %281 : vector<8x32xf32>
    %283 = vector.extract_strided_slice %270 {offsets = [0, 64], sizes = [8, 32], strides = [1, 1]} : vector<8x128xf32> to vector<8x32xf32>
    %284 = math.tanh %283 : vector<8x32xf32>
    %285 = vector.extract_strided_slice %270 {offsets = [0, 96], sizes = [8, 32], strides = [1, 1]} : vector<8x128xf32> to vector<8x32xf32>
    %286 = arith.negf %285 : vector<8x32xf32>
    %287 = math.exp %286 : vector<8x32xf32>
    %cst_74 = arith.constant 1.000000e+00 : f32
    %288 = vector.broadcast %cst_74 : f32 to vector<8x32xf32>
    %289 = arith.addf %288, %287 : vector<8x32xf32>
    %290 = arith.divf %288, %289 : vector<8x32xf32>
    %291 = arith.mulf %282, %267 : vector<8x32xf32>
    %292 = arith.mulf %276, %284 : vector<8x32xf32>
    %293 = arith.addf %291, %292 : vector<8x32xf32>
    %294 = math.tanh %293 : vector<8x32xf32>
    %295 = arith.mulf %290, %294 : vector<8x32xf32>
    %296 = vector.extract_strided_slice %265 {offsets = [8, 0], sizes = [8, 128], strides = [1, 1]} : vector<64x128xf32> to vector<8x128xf32>
    %cst_75 = arith.constant dense<0.000000e+00> : vector<8x128xf32>
    %297 = tpu.matmul %295, %259, %cst_75 {dimension_numbers = #tpu.dot_dimension_numbers<[1], [0], [0], [1], [0, 0, 1, 1], [], []>} : vector<8x32xf32>, vector<32x128xf32>, vector<8x128xf32> -> vector<8x128xf32>
    %298 = arith.addf %296, %297 : vector<8x128xf32>
    %299 = vector.extract_strided_slice %298 {offsets = [0, 0], sizes = [8, 32], strides = [1, 1]} : vector<8x128xf32> to vector<8x32xf32>
    %300 = arith.negf %299 : vector<8x32xf32>
    %301 = math.exp %300 : vector<8x32xf32>
    %cst_76 = arith.constant 1.000000e+00 : f32
    %302 = vector.broadcast %cst_76 : f32 to vector<8x32xf32>
    %303 = arith.addf %302, %301 : vector<8x32xf32>
    %304 = arith.divf %302, %303 : vector<8x32xf32>
    %305 = vector.extract_strided_slice %298 {offsets = [0, 32], sizes = [8, 32], strides = [1, 1]} : vector<8x128xf32> to vector<8x32xf32>
    %306 = arith.negf %305 : vector<8x32xf32>
    %307 = math.exp %306 : vector<8x32xf32>
    %cst_77 = arith.constant 1.000000e+00 : f32
    %308 = vector.broadcast %cst_77 : f32 to vector<8x32xf32>
    %309 = arith.addf %308, %307 : vector<8x32xf32>
    %310 = arith.divf %308, %309 : vector<8x32xf32>
    %311 = vector.extract_strided_slice %298 {offsets = [0, 64], sizes = [8, 32], strides = [1, 1]} : vector<8x128xf32> to vector<8x32xf32>
    %312 = math.tanh %311 : vector<8x32xf32>
    %313 = vector.extract_strided_slice %298 {offsets = [0, 96], sizes = [8, 32], strides = [1, 1]} : vector<8x128xf32> to vector<8x32xf32>
    %314 = arith.negf %313 : vector<8x32xf32>
    %315 = math.exp %314 : vector<8x32xf32>
    %cst_78 = arith.constant 1.000000e+00 : f32
    %316 = vector.broadcast %cst_78 : f32 to vector<8x32xf32>
    %317 = arith.addf %316, %315 : vector<8x32xf32>
    %318 = arith.divf %316, %317 : vector<8x32xf32>
    %319 = arith.mulf %310, %293 : vector<8x32xf32>
    %320 = arith.mulf %304, %312 : vector<8x32xf32>
    %321 = arith.addf %319, %320 : vector<8x32xf32>
    %322 = math.tanh %321 : vector<8x32xf32>
    %323 = arith.mulf %318, %322 : vector<8x32xf32>
    %324 = vector.extract_strided_slice %265 {offsets = [16, 0], sizes = [8, 128], strides = [1, 1]} : vector<64x128xf32> to vector<8x128xf32>
    %cst_79 = arith.constant dense<0.000000e+00> : vector<8x128xf32>
    %325 = tpu.matmul %323, %259, %cst_79 {dimension_numbers = #tpu.dot_dimension_numbers<[1], [0], [0], [1], [0, 0, 1, 1], [], []>} : vector<8x32xf32>, vector<32x128xf32>, vector<8x128xf32> -> vector<8x128xf32>
    %326 = arith.addf %324, %325 : vector<8x128xf32>
    %327 = vector.extract_strided_slice %326 {offsets = [0, 0], sizes = [8, 32], strides = [1, 1]} : vector<8x128xf32> to vector<8x32xf32>
    %328 = arith.negf %327 : vector<8x32xf32>
    %329 = math.exp %328 : vector<8x32xf32>
    %cst_80 = arith.constant 1.000000e+00 : f32
    %330 = vector.broadcast %cst_80 : f32 to vector<8x32xf32>
    %331 = arith.addf %330, %329 : vector<8x32xf32>
    %332 = arith.divf %330, %331 : vector<8x32xf32>
    %333 = vector.extract_strided_slice %326 {offsets = [0, 32], sizes = [8, 32], strides = [1, 1]} : vector<8x128xf32> to vector<8x32xf32>
    %334 = arith.negf %333 : vector<8x32xf32>
    %335 = math.exp %334 : vector<8x32xf32>
    %cst_81 = arith.constant 1.000000e+00 : f32
    %336 = vector.broadcast %cst_81 : f32 to vector<8x32xf32>
    %337 = arith.addf %336, %335 : vector<8x32xf32>
    %338 = arith.divf %336, %337 : vector<8x32xf32>
    %339 = vector.extract_strided_slice %326 {offsets = [0, 64], sizes = [8, 32], strides = [1, 1]} : vector<8x128xf32> to vector<8x32xf32>
    %340 = math.tanh %339 : vector<8x32xf32>
    %341 = vector.extract_strided_slice %326 {offsets = [0, 96], sizes = [8, 32], strides = [1, 1]} : vector<8x128xf32> to vector<8x32xf32>
    %342 = arith.negf %341 : vector<8x32xf32>
    %343 = math.exp %342 : vector<8x32xf32>
    %cst_82 = arith.constant 1.000000e+00 : f32
    %344 = vector.broadcast %cst_82 : f32 to vector<8x32xf32>
    %345 = arith.addf %344, %343 : vector<8x32xf32>
    %346 = arith.divf %344, %345 : vector<8x32xf32>
    %347 = arith.mulf %338, %321 : vector<8x32xf32>
    %348 = arith.mulf %332, %340 : vector<8x32xf32>
    %349 = arith.addf %347, %348 : vector<8x32xf32>
    %350 = math.tanh %349 : vector<8x32xf32>
    %351 = arith.mulf %346, %350 : vector<8x32xf32>
    %352 = vector.extract_strided_slice %265 {offsets = [24, 0], sizes = [8, 128], strides = [1, 1]} : vector<64x128xf32> to vector<8x128xf32>
    %cst_83 = arith.constant dense<0.000000e+00> : vector<8x128xf32>
    %353 = tpu.matmul %351, %259, %cst_83 {dimension_numbers = #tpu.dot_dimension_numbers<[1], [0], [0], [1], [0, 0, 1, 1], [], []>} : vector<8x32xf32>, vector<32x128xf32>, vector<8x128xf32> -> vector<8x128xf32>
    %354 = arith.addf %352, %353 : vector<8x128xf32>
    %355 = vector.extract_strided_slice %354 {offsets = [0, 0], sizes = [8, 32], strides = [1, 1]} : vector<8x128xf32> to vector<8x32xf32>
    %356 = arith.negf %355 : vector<8x32xf32>
    %357 = math.exp %356 : vector<8x32xf32>
    %cst_84 = arith.constant 1.000000e+00 : f32
    %358 = vector.broadcast %cst_84 : f32 to vector<8x32xf32>
    %359 = arith.addf %358, %357 : vector<8x32xf32>
    %360 = arith.divf %358, %359 : vector<8x32xf32>
    %361 = vector.extract_strided_slice %354 {offsets = [0, 32], sizes = [8, 32], strides = [1, 1]} : vector<8x128xf32> to vector<8x32xf32>
    %362 = arith.negf %361 : vector<8x32xf32>
    %363 = math.exp %362 : vector<8x32xf32>
    %cst_85 = arith.constant 1.000000e+00 : f32
    %364 = vector.broadcast %cst_85 : f32 to vector<8x32xf32>
    %365 = arith.addf %364, %363 : vector<8x32xf32>
    %366 = arith.divf %364, %365 : vector<8x32xf32>
    %367 = vector.extract_strided_slice %354 {offsets = [0, 64], sizes = [8, 32], strides = [1, 1]} : vector<8x128xf32> to vector<8x32xf32>
    %368 = math.tanh %367 : vector<8x32xf32>
    %369 = vector.extract_strided_slice %354 {offsets = [0, 96], sizes = [8, 32], strides = [1, 1]} : vector<8x128xf32> to vector<8x32xf32>
    %370 = arith.negf %369 : vector<8x32xf32>
    %371 = math.exp %370 : vector<8x32xf32>
    %cst_86 = arith.constant 1.000000e+00 : f32
    %372 = vector.broadcast %cst_86 : f32 to vector<8x32xf32>
    %373 = arith.addf %372, %371 : vector<8x32xf32>
    %374 = arith.divf %372, %373 : vector<8x32xf32>
    %375 = arith.mulf %366, %349 : vector<8x32xf32>
    %376 = arith.mulf %360, %368 : vector<8x32xf32>
    %377 = arith.addf %375, %376 : vector<8x32xf32>
    %378 = math.tanh %377 : vector<8x32xf32>
    %379 = arith.mulf %374, %378 : vector<8x32xf32>
    %380 = vector.extract_strided_slice %265 {offsets = [32, 0], sizes = [8, 128], strides = [1, 1]} : vector<64x128xf32> to vector<8x128xf32>
    %cst_87 = arith.constant dense<0.000000e+00> : vector<8x128xf32>
    %381 = tpu.matmul %379, %259, %cst_87 {dimension_numbers = #tpu.dot_dimension_numbers<[1], [0], [0], [1], [0, 0, 1, 1], [], []>} : vector<8x32xf32>, vector<32x128xf32>, vector<8x128xf32> -> vector<8x128xf32>
    %382 = arith.addf %380, %381 : vector<8x128xf32>
    %383 = vector.extract_strided_slice %382 {offsets = [0, 0], sizes = [8, 32], strides = [1, 1]} : vector<8x128xf32> to vector<8x32xf32>
    %384 = arith.negf %383 : vector<8x32xf32>
    %385 = math.exp %384 : vector<8x32xf32>
    %cst_88 = arith.constant 1.000000e+00 : f32
    %386 = vector.broadcast %cst_88 : f32 to vector<8x32xf32>
    %387 = arith.addf %386, %385 : vector<8x32xf32>
    %388 = arith.divf %386, %387 : vector<8x32xf32>
    %389 = vector.extract_strided_slice %382 {offsets = [0, 32], sizes = [8, 32], strides = [1, 1]} : vector<8x128xf32> to vector<8x32xf32>
    %390 = arith.negf %389 : vector<8x32xf32>
    %391 = math.exp %390 : vector<8x32xf32>
    %cst_89 = arith.constant 1.000000e+00 : f32
    %392 = vector.broadcast %cst_89 : f32 to vector<8x32xf32>
    %393 = arith.addf %392, %391 : vector<8x32xf32>
    %394 = arith.divf %392, %393 : vector<8x32xf32>
    %395 = vector.extract_strided_slice %382 {offsets = [0, 64], sizes = [8, 32], strides = [1, 1]} : vector<8x128xf32> to vector<8x32xf32>
    %396 = math.tanh %395 : vector<8x32xf32>
    %397 = vector.extract_strided_slice %382 {offsets = [0, 96], sizes = [8, 32], strides = [1, 1]} : vector<8x128xf32> to vector<8x32xf32>
    %398 = arith.negf %397 : vector<8x32xf32>
    %399 = math.exp %398 : vector<8x32xf32>
    %cst_90 = arith.constant 1.000000e+00 : f32
    %400 = vector.broadcast %cst_90 : f32 to vector<8x32xf32>
    %401 = arith.addf %400, %399 : vector<8x32xf32>
    %402 = arith.divf %400, %401 : vector<8x32xf32>
    %403 = arith.mulf %394, %377 : vector<8x32xf32>
    %404 = arith.mulf %388, %396 : vector<8x32xf32>
    %405 = arith.addf %403, %404 : vector<8x32xf32>
    %406 = math.tanh %405 : vector<8x32xf32>
    %407 = arith.mulf %402, %406 : vector<8x32xf32>
    %408 = vector.extract_strided_slice %265 {offsets = [40, 0], sizes = [8, 128], strides = [1, 1]} : vector<64x128xf32> to vector<8x128xf32>
    %cst_91 = arith.constant dense<0.000000e+00> : vector<8x128xf32>
    %409 = tpu.matmul %407, %259, %cst_91 {dimension_numbers = #tpu.dot_dimension_numbers<[1], [0], [0], [1], [0, 0, 1, 1], [], []>} : vector<8x32xf32>, vector<32x128xf32>, vector<8x128xf32> -> vector<8x128xf32>
    %410 = arith.addf %408, %409 : vector<8x128xf32>
    %411 = vector.extract_strided_slice %410 {offsets = [0, 0], sizes = [8, 32], strides = [1, 1]} : vector<8x128xf32> to vector<8x32xf32>
    %412 = arith.negf %411 : vector<8x32xf32>
    %413 = math.exp %412 : vector<8x32xf32>
    %cst_92 = arith.constant 1.000000e+00 : f32
    %414 = vector.broadcast %cst_92 : f32 to vector<8x32xf32>
    %415 = arith.addf %414, %413 : vector<8x32xf32>
    %416 = arith.divf %414, %415 : vector<8x32xf32>
    %417 = vector.extract_strided_slice %410 {offsets = [0, 32], sizes = [8, 32], strides = [1, 1]} : vector<8x128xf32> to vector<8x32xf32>
    %418 = arith.negf %417 : vector<8x32xf32>
    %419 = math.exp %418 : vector<8x32xf32>
    %cst_93 = arith.constant 1.000000e+00 : f32
    %420 = vector.broadcast %cst_93 : f32 to vector<8x32xf32>
    %421 = arith.addf %420, %419 : vector<8x32xf32>
    %422 = arith.divf %420, %421 : vector<8x32xf32>
    %423 = vector.extract_strided_slice %410 {offsets = [0, 64], sizes = [8, 32], strides = [1, 1]} : vector<8x128xf32> to vector<8x32xf32>
    %424 = math.tanh %423 : vector<8x32xf32>
    %425 = vector.extract_strided_slice %410 {offsets = [0, 96], sizes = [8, 32], strides = [1, 1]} : vector<8x128xf32> to vector<8x32xf32>
    %426 = arith.negf %425 : vector<8x32xf32>
    %427 = math.exp %426 : vector<8x32xf32>
    %cst_94 = arith.constant 1.000000e+00 : f32
    %428 = vector.broadcast %cst_94 : f32 to vector<8x32xf32>
    %429 = arith.addf %428, %427 : vector<8x32xf32>
    %430 = arith.divf %428, %429 : vector<8x32xf32>
    %431 = arith.mulf %422, %405 : vector<8x32xf32>
    %432 = arith.mulf %416, %424 : vector<8x32xf32>
    %433 = arith.addf %431, %432 : vector<8x32xf32>
    %434 = math.tanh %433 : vector<8x32xf32>
    %435 = arith.mulf %430, %434 : vector<8x32xf32>
    %436 = vector.extract_strided_slice %265 {offsets = [48, 0], sizes = [8, 128], strides = [1, 1]} : vector<64x128xf32> to vector<8x128xf32>
    %cst_95 = arith.constant dense<0.000000e+00> : vector<8x128xf32>
    %437 = tpu.matmul %435, %259, %cst_95 {dimension_numbers = #tpu.dot_dimension_numbers<[1], [0], [0], [1], [0, 0, 1, 1], [], []>} : vector<8x32xf32>, vector<32x128xf32>, vector<8x128xf32> -> vector<8x128xf32>
    %438 = arith.addf %436, %437 : vector<8x128xf32>
    %439 = vector.extract_strided_slice %438 {offsets = [0, 0], sizes = [8, 32], strides = [1, 1]} : vector<8x128xf32> to vector<8x32xf32>
    %440 = arith.negf %439 : vector<8x32xf32>
    %441 = math.exp %440 : vector<8x32xf32>
    %cst_96 = arith.constant 1.000000e+00 : f32
    %442 = vector.broadcast %cst_96 : f32 to vector<8x32xf32>
    %443 = arith.addf %442, %441 : vector<8x32xf32>
    %444 = arith.divf %442, %443 : vector<8x32xf32>
    %445 = vector.extract_strided_slice %438 {offsets = [0, 32], sizes = [8, 32], strides = [1, 1]} : vector<8x128xf32> to vector<8x32xf32>
    %446 = arith.negf %445 : vector<8x32xf32>
    %447 = math.exp %446 : vector<8x32xf32>
    %cst_97 = arith.constant 1.000000e+00 : f32
    %448 = vector.broadcast %cst_97 : f32 to vector<8x32xf32>
    %449 = arith.addf %448, %447 : vector<8x32xf32>
    %450 = arith.divf %448, %449 : vector<8x32xf32>
    %451 = vector.extract_strided_slice %438 {offsets = [0, 64], sizes = [8, 32], strides = [1, 1]} : vector<8x128xf32> to vector<8x32xf32>
    %452 = math.tanh %451 : vector<8x32xf32>
    %453 = vector.extract_strided_slice %438 {offsets = [0, 96], sizes = [8, 32], strides = [1, 1]} : vector<8x128xf32> to vector<8x32xf32>
    %454 = arith.negf %453 : vector<8x32xf32>
    %455 = math.exp %454 : vector<8x32xf32>
    %cst_98 = arith.constant 1.000000e+00 : f32
    %456 = vector.broadcast %cst_98 : f32 to vector<8x32xf32>
    %457 = arith.addf %456, %455 : vector<8x32xf32>
    %458 = arith.divf %456, %457 : vector<8x32xf32>
    %459 = arith.mulf %450, %433 : vector<8x32xf32>
    %460 = arith.mulf %444, %452 : vector<8x32xf32>
    %461 = arith.addf %459, %460 : vector<8x32xf32>
    %462 = math.tanh %461 : vector<8x32xf32>
    %463 = arith.mulf %458, %462 : vector<8x32xf32>
    %464 = vector.extract_strided_slice %265 {offsets = [56, 0], sizes = [8, 128], strides = [1, 1]} : vector<64x128xf32> to vector<8x128xf32>
    %cst_99 = arith.constant dense<0.000000e+00> : vector<8x128xf32>
    %465 = tpu.matmul %463, %259, %cst_99 {dimension_numbers = #tpu.dot_dimension_numbers<[1], [0], [0], [1], [0, 0, 1, 1], [], []>} : vector<8x32xf32>, vector<32x128xf32>, vector<8x128xf32> -> vector<8x128xf32>
    %466 = arith.addf %464, %465 : vector<8x128xf32>
    %467 = vector.extract_strided_slice %466 {offsets = [0, 0], sizes = [8, 32], strides = [1, 1]} : vector<8x128xf32> to vector<8x32xf32>
    %468 = arith.negf %467 : vector<8x32xf32>
    %469 = math.exp %468 : vector<8x32xf32>
    %cst_100 = arith.constant 1.000000e+00 : f32
    %470 = vector.broadcast %cst_100 : f32 to vector<8x32xf32>
    %471 = arith.addf %470, %469 : vector<8x32xf32>
    %472 = arith.divf %470, %471 : vector<8x32xf32>
    %473 = vector.extract_strided_slice %466 {offsets = [0, 32], sizes = [8, 32], strides = [1, 1]} : vector<8x128xf32> to vector<8x32xf32>
    %474 = arith.negf %473 : vector<8x32xf32>
    %475 = math.exp %474 : vector<8x32xf32>
    %cst_101 = arith.constant 1.000000e+00 : f32
    %476 = vector.broadcast %cst_101 : f32 to vector<8x32xf32>
    %477 = arith.addf %476, %475 : vector<8x32xf32>
    %478 = arith.divf %476, %477 : vector<8x32xf32>
    %479 = vector.extract_strided_slice %466 {offsets = [0, 64], sizes = [8, 32], strides = [1, 1]} : vector<8x128xf32> to vector<8x32xf32>
    %480 = math.tanh %479 : vector<8x32xf32>
    %481 = vector.extract_strided_slice %466 {offsets = [0, 96], sizes = [8, 32], strides = [1, 1]} : vector<8x128xf32> to vector<8x32xf32>
    %482 = arith.negf %481 : vector<8x32xf32>
    %483 = math.exp %482 : vector<8x32xf32>
    %cst_102 = arith.constant 1.000000e+00 : f32
    %484 = vector.broadcast %cst_102 : f32 to vector<8x32xf32>
    %485 = arith.addf %484, %483 : vector<8x32xf32>
    %486 = arith.divf %484, %485 : vector<8x32xf32>
    %487 = arith.mulf %478, %461 : vector<8x32xf32>
    %488 = arith.mulf %472, %480 : vector<8x32xf32>
    %489 = arith.addf %487, %488 : vector<8x32xf32>
    %490 = math.tanh %489 : vector<8x32xf32>
    %491 = arith.mulf %486, %490 : vector<8x32xf32>
    %c0_103 = arith.constant 0 : index
    %c0_104 = arith.constant 0 : index
    %492 = vector.load %arg7[%c0_103, %c0_104] : memref<32x384xf32, #tpu.memory_space<vmem>>, vector<32x384xf32>
    %c0_105 = arith.constant 0 : index
    %c0_106 = arith.constant 0 : index
    %493 = vector.load %arg8[%c0_105, %c0_106] : memref<1x384xf32, #tpu.memory_space<vmem>>, vector<1x384xf32>
    %c0_107 = arith.constant 0 : index
    %c0_108 = arith.constant 0 : index
    %494 = vector.load %arg9[%c0_107, %c0_108] : memref<384x256xf32, #tpu.memory_space<vmem>>, vector<384x256xf32>
    %c0_109 = arith.constant 0 : index
    %c0_110 = arith.constant 0 : index
    %495 = vector.load %arg10[%c0_109, %c0_110] : memref<1x256xf32, #tpu.memory_space<vmem>>, vector<1x256xf32>
    %c0_111 = arith.constant 0 : index
    %c0_112 = arith.constant 0 : index
    %496 = vector.load %arg11[%c0_111, %c0_112] : memref<256x128xf32, #tpu.memory_space<vmem>>, vector<256x128xf32>
    %c0_113 = arith.constant 0 : index
    %c0_114 = arith.constant 0 : index
    %497 = vector.load %arg12[%c0_113, %c0_114] : memref<1x128xf32, #tpu.memory_space<vmem>>, vector<1x128xf32>
    %c0_115 = arith.constant 0 : index
    %c0_116 = arith.constant 0 : index
    %498 = vector.load %arg13[%c0_115, %c0_116] : memref<128x128xf32, #tpu.memory_space<vmem>>, vector<128x128xf32>
    %c0_117 = arith.constant 0 : index
    %c0_118 = arith.constant 0 : index
    %499 = vector.load %arg14[%c0_117, %c0_118] : memref<1x128xf32, #tpu.memory_space<vmem>>, vector<1x128xf32>
    %cst_119 = arith.constant dense<0.000000e+00> : vector<8x384xf32>
    %500 = tpu.matmul %491, %492, %cst_119 {dimension_numbers = #tpu.dot_dimension_numbers<[1], [0], [0], [1], [0, 0, 1, 1], [], []>} : vector<8x32xf32>, vector<32x384xf32>, vector<8x384xf32> -> vector<8x384xf32>
    %501 = vector.broadcast %493 : vector<1x384xf32> to vector<8x384xf32>
    %502 = arith.addf %500, %501 : vector<8x384xf32>
    %cst_120 = arith.constant 0.000000e+00 : f32
    %503 = vector.broadcast %cst_120 : f32 to vector<8x384xf32>
    %504 = arith.maximumf %502, %503 : vector<8x384xf32>
    %cst_121 = arith.constant dense<0.000000e+00> : vector<8x256xf32>
    %505 = tpu.matmul %504, %494, %cst_121 {dimension_numbers = #tpu.dot_dimension_numbers<[1], [0], [0], [1], [0, 0, 1, 1], [], []>} : vector<8x384xf32>, vector<384x256xf32>, vector<8x256xf32> -> vector<8x256xf32>
    %506 = vector.broadcast %495 : vector<1x256xf32> to vector<8x256xf32>
    %507 = arith.addf %505, %506 : vector<8x256xf32>
    %cst_122 = arith.constant 0.000000e+00 : f32
    %508 = vector.broadcast %cst_122 : f32 to vector<8x256xf32>
    %509 = arith.maximumf %507, %508 : vector<8x256xf32>
    %cst_123 = arith.constant dense<0.000000e+00> : vector<8x128xf32>
    %510 = tpu.matmul %509, %496, %cst_123 {dimension_numbers = #tpu.dot_dimension_numbers<[1], [0], [0], [1], [0, 0, 1, 1], [], []>} : vector<8x256xf32>, vector<256x128xf32>, vector<8x128xf32> -> vector<8x128xf32>
    %511 = vector.broadcast %497 : vector<1x128xf32> to vector<8x128xf32>
    %512 = arith.addf %510, %511 : vector<8x128xf32>
    %cst_124 = arith.constant 0.000000e+00 : f32
    %513 = vector.broadcast %cst_124 : f32 to vector<8x128xf32>
    %514 = arith.maximumf %512, %513 : vector<8x128xf32>
    %cst_125 = arith.constant dense<0.000000e+00> : vector<8x128xf32>
    %515 = tpu.matmul %514, %498, %cst_125 {dimension_numbers = #tpu.dot_dimension_numbers<[1], [0], [0], [1], [0, 0, 1, 1], [], []>} : vector<8x128xf32>, vector<128x128xf32>, vector<8x128xf32> -> vector<8x128xf32>
    %516 = vector.broadcast %499 : vector<1x128xf32> to vector<8x128xf32>
    %517 = arith.addf %515, %516 : vector<8x128xf32>
    %c0_126 = arith.constant 0 : index
    %c0_127 = arith.constant 0 : index
    %518 = vector.load %arg15[%c0_126, %c0_127] : memref<8x128xf32, #tpu.memory_space<vmem>>, vector<8x128xf32>
    tpu.vector_store %arg15[%c0_126, %c0_127], %517 {strides = array<i32>} : memref<8x128xf32, #tpu.memory_space<vmem>>, vector<8x128xf32>,
    return
  }
}

</mosaic_0001>

<bundles_post_ra>
// kernel: tpu_custom_call.1
= control target key start
LH: loop header
LB: loop body
LE: loop exit
PB: predicated region body
PF: predicated region fallthrough
CT: control target
= control target key end

     0   :  { %20 = vsyncpa [#allocation4], 0  ;;  %s4051_s0 = inlined_call_operand.vmem [shape: f32[8,8,4], index: 0, kind: input, shape index: {}]   ;;  %s4052_s1 = inlined_call_operand.vmem [shape: f32[4,128], index: 1, kind: input, shape index: {}]   ;;  %s4053_s2 = inlined_call_operand.hbm [shape: f32[32,128], index: 2, kind: input, shape index: {}]   ;;  %s4054_s3 = inlined_call_operand.vmem [shape: f32[1,128], index: 3, kind: input, shape index: {}]   ;;  %s4055_s4 = inlined_call_operand.hbm [shape: f32[32,128], index: 4, kind: input, shape index: {}]   ;;  %s4056_s5 = inlined_call_operand.hbm [shape: f32[32,128], index: 5, kind: input, shape index: {}]   ;;  %s4057_s6 = inlined_call_operand.vmem [shape: f32[1,128], index: 6, kind: input, shape index: {}]   ;;  %s4058_s7 = inlined_call_operand.vmem [shape: f32[32,384], index: 7, kind: input, shape index: {}]   ;;  %s4059_s8 = inlined_call_operand.vmem [shape: f32[1,384], index: 8, kind: input, shape index: {}]   ;;  %s4060_s9 = inlined_call_operand.hbm [shape: f32[384,256], index: 9, kind: input, shape index: {}]   ;;  %s4061_s10 = inlined_call_operand.vmem [shape: f32[1,256], index: 10, kind: input, shape index: {}]   ;;  %s4062_s11 = inlined_call_operand.hbm [shape: f32[256,128], index: 11, kind: input, shape index: {}]   ;;  %s4063_s12 = inlined_call_operand.vmem [shape: f32[1,128], index: 12, kind: input, shape index: {}]   ;;  %s4064_s13 = inlined_call_operand.hbm [shape: f32[128,128], index: 13, kind: input, shape index: {}]   ;;  %s4065_s14 = inlined_call_operand.vmem [shape: f32[1,128], index: 14, kind: input, shape index: {}]   ;;  %s4066_s15 = inlined_call_operand.hbm [shape: f32[8,128], index: 15, kind: output, shape index: {}]  }
   0x1   :  { %21 = vsyncpa [#allocation7], 0 }
   0x2   :  { %22 = vsyncpa [#allocation10], 0 }
   0x3   :  { %23 = vsyncpa [#allocation13], 0 }
   0x4   :  { %24 = vsyncpa [#allocation5], 0  ;;  %s3471_s18 = smov [#allocation6]   ;;  %s3472_s20 = smov [#allocation9]  }
   0x5   :  { %s48_s19 = sshll.u32 %s3471_s18, 4  ;;  %s78_s21 = sshll.u32 %s3472_s20, 4  ;;  %s49_s19 = int_to_ptr.vmem [resolvable:$true] %s48_s19  ;;  %s79_s21 = int_to_ptr.vmem [resolvable:$true] %s78_s21 }
   0x6   :  { %s3329_s22 = scalar_lea.vmem %s49_s19, 512  ;;  %p3334_p1 = scmp.lt.s32.totalorder %s49_s19, %s49_s19 }
   0x7   :  { %p3330_p0 = scmp.ne.s32.totalorder %s49_s19, %s3329_s22  ;;  %p3335_p2 = scmp.lt.s32.totalorder %s3329_s22, %s3329_s22 }
   0x9   :  { %p3336_p3 = por %p3335_p2, %p3334_p1 }
   0xb   :  { %p3337_p4 = pnand %p3336_p3, %p3330_p0 }
   0xd   :  { %3340 = shalt.err (!%p3337_p4)
}
   0xe   :  { %s3473_s23 = smov 128   ;;  %s3474_s24 = smov 8  }
   0xf   :  { %54 = dma.hbm_to_vmem [thread:$0]  %s4055_s4, 512, %s49_s19, [#allocation7], %s3473_s23, %s3473_s23, %s3474_s24  }
  0x10   :  { %s3349_s27 = scalar_lea.vmem %s79_s21, 12288  ;;  %p3354_p6 = scmp.lt.s32.totalorder %s79_s21, %s79_s21 }
  0x11   :  { %p3350_p5 = scmp.ne.s32.totalorder %s79_s21, %s3349_s27  ;;  %p3355_p7 = scmp.lt.s32.totalorder %s3349_s27, %s3349_s27 }
  0x13   :  { %p3356_p8 = por %p3355_p7, %p3354_p6 }
  0x15   :  { %p3357_p9 = pnand %p3356_p8, %p3350_p5 }
  0x17   :  { %3360 = shalt.err (!%p3357_p9)
}
  0x18   :  { %s3475_s28 = smov 256   ;;  %s3476_s29 = smov 16  }
  0x19   :  { %84 = dma.hbm_to_vmem [thread:$0]  %s4060_s9, 12288, %s79_s21, [#allocation10], %s3475_s28, %s3475_s28, %s3476_s29  }
  0x1a   :  { %s3477_s17 = smov [#allocation3]   ;;  %s3478_s20 = smov [#allocation8]  }
  0x1b   :  { %s34_s18 = sshll.u32 %s3477_s17, 4  ;;  %s60_s22 = sshll.u32 %s3478_s20, 4  ;;  %s35_s18 = int_to_ptr.vmem [resolvable:$true] %s34_s18  ;;  %s61_s22 = int_to_ptr.vmem [resolvable:$true] %s60_s22 }
  0x1c   :  { %s3369_s4 = scalar_lea.vmem %s35_s18, 512  ;;  %p3374_p11 = scmp.lt.s32.totalorder %s35_s18, %s35_s18 }
  0x1d   :  { %p3370_p10 = scmp.ne.s32.totalorder %s35_s18, %s3369_s4  ;;  %p3375_p12 = scmp.lt.s32.totalorder %s3369_s4, %s3369_s4 }
  0x1f   :  { %p3376_p13 = por %p3375_p12, %p3374_p11 }
  0x21   :  { %p3377_p0 = pnand %p3376_p13, %p3370_p10 }
  0x23   :  { %3380 = shalt.err (!%p3377_p0)
}
  0x24   :  { %40 = dma.hbm_to_vmem [thread:$0]  %s4053_s2, 512, %s35_s18, [#allocation4], %s3473_s23, %s3473_s23, %s3474_s24  }
  0x25   :  { %s3389_s9 = scalar_lea.vmem %s61_s22, 512  ;;  %p3394_p2 = scmp.lt.s32.totalorder %s61_s22, %s61_s22 }
  0x26   :  { %p3390_p1 = scmp.ne.s32.totalorder %s61_s22, %s3389_s9  ;;  %p3395_p3 = scmp.lt.s32.totalorder %s3389_s9, %s3389_s9 }
  0x28   :  { %p3396_p4 = por %p3395_p3, %p3394_p2 }
  0x2a   :  { %p3397_p5 = pnand %p3396_p4, %p3390_p1 }
  0x2c   :  { %3400 = shalt.err (!%p3397_p5)
}
  0x2d   :  { %66 = dma.hbm_to_vmem [thread:$0]  %s4056_s5, 512, %s61_s22, [#allocation7], %s3473_s23, %s3473_s23, %s3474_s24  }
  0x2e   :  { %s3479_s27 = smov [#allocation11]   ;;  %s3480_s29 = smov [#allocation12]  }
  0x2f   :  { %s92_s28 = sshll.u32 %s3479_s27, 4  ;;  %s106_s30 = sshll.u32 %s3480_s29, 4  ;;  %s93_s28 = int_to_ptr.vmem [resolvable:$true] %s92_s28  ;;  %s107_s30 = int_to_ptr.vmem [resolvable:$true] %s106_s30 }
  0x30   :  { %s3409_s2 = scalar_lea.vmem %s93_s28, 4096  ;;  %p3414_p7 = scmp.lt.s32.totalorder %s93_s28, %s93_s28 }
  0x31   :  { %p3410_p6 = scmp.ne.s32.totalorder %s93_s28, %s3409_s2  ;;  %p3415_p8 = scmp.lt.s32.totalorder %s3409_s2, %s3409_s2 }
  0x33   :  { %p3416_p9 = por %p3415_p8, %p3414_p7 }
  0x35   :  { %p3417_p10 = pnand %p3416_p9, %p3410_p6 }
  0x37   :  { %3420 = shalt.err (!%p3417_p10)
}
  0x38   :  { %98 = dma.hbm_to_vmem [thread:$0]  %s4062_s11, 4096, %s93_s28, [#allocation10], %s3473_s23, %s3473_s23, %s3474_s24  }
  0x39   :  { %s3429_s5 = scalar_lea.vmem %s107_s30, 2048  ;;  %p3434_p12 = scmp.lt.s32.totalorder %s107_s30, %s107_s30 }
  0x3a   :  { %p3430_p11 = scmp.ne.s32.totalorder %s107_s30, %s3429_s5  ;;  %p3435_p13 = scmp.lt.s32.totalorder %s3429_s5, %s3429_s5 }
  0x3c   :  { %p3436_p0 = por %p3435_p13, %p3434_p12 }
  0x3e   :  { %p3437_p1 = pnand %p3436_p0, %p3430_p11 }
  0x40   :  { %3440 = shalt.err (!%p3437_p1)
}
  0x41   :  { %112 = dma.hbm_to_vmem [thread:$0]  %s4064_s13, 2048, %s107_s30, [#allocation13], %s3473_s23, %s3473_s23, %s3474_s24  }
  0x42   :  { %3461 = dma.done.wait [#allocation4], 512  }
  0x43   :  { %3462 = vsyncadd [#allocation4], 4294966784 }
  0x44   :  { %3463 = dma.done.wait [#allocation7], 1024  }
  0x45   :  { %3464 = vsyncadd [#allocation7], 4294966272 }
  0x46   :  { %3465 = dma.done.wait [#allocation10], 16384  }
  0x47   :  { %3466 = vsyncadd [#allocation10], 4294950912 }
  0x48   :  { %3467 = dma.done.wait [#allocation13], 2048  }
  0x49   :  { %3468 = vsyncadd [#allocation13], 4294965248  ;;  %v3481_v0 = vmov 0.0   ;;  %vm3482_vm0 = vmmov 0   ;;  %vm178_vm1 = vcmask 1043456   ;;  %vm153_vm2 = vcmask 31744  }
  0x4a   :  { %2958 = vmatprep.subr.mxu0 %v3481_v0  ;;  %2966 = vmatprep.mubr.msk.f32.mxu0 %vm3482_vm0, %v3481_v0  ;;  %v133_v1 = vld [vmem:[%s4052_s1] sm:$0xf]  ;;  %v140_v3 = vld [vmem:[%s4051_s0 + $0x8] sm:$0xff]  ;;  %v3612_v4 = vld [vmem:[#allocation3 + $0x18] sm:$0xff]  ;;  %s3484_s5 = smov 32   ;;  %vm287_vm3 = vcmask 261120  }
  0x4b   :  { %v139_v2 = vld [vmem:[%s4051_s0] sm:$0xff]  ;;  %2922 = vmatprep.subr.msk.mxu1 %vm178_vm1, %v133_v1  ;;  %v141_v5 = vld [vmem:[%s4051_s0 + $0x10] sm:$0xff]  ;;  %2959 = vmatpush3.msra.mxu0 %v3612_v4  ;;  %v142_v7 = vld [vmem:[%s4051_s0 + $0x18] sm:$0xff]  ;;  %s3485_s23 = smov [#allocation14]  }
  0x4c   :  { %2924 = vmatprep.mubr.msk.f32.mxu1 %vm153_vm2, %v139_v2  ;;  %2923 = vmatpush3.msk.msra.mxu1 %vm178_vm1, %v133_v1  ;;  %v3620_v6 = vld [vmem:[#allocation3 + $0x10] sm:$0xff]  ;;  %v143_v8 = vld [vmem:[%s4051_s0 + $0x20] sm:$0xff]  ;;  %v3631_v9 = vld [vmem:[#allocation3 + $0x8] sm:$0xff]  ;;  %s2699_s24 = sshll.u32 %s3485_s23, 4  ;;  %s2700_s24 = int_to_ptr.vmem [resolvable:$true] %s2699_s24 }
  0x4d   :  { %2925 = vmatmul.mubr.msk.f32.vlgmr.msra.gmra.mxu1 %vm153_vm2, %v140_v3  ;;  %2936 = vmatprep.subr.mxu1 %v3481_v0  ;;  %v3638_v10 = vld [vmem:[#allocation3] sm:$0xff]  ;;  %v144_v11 = vld [vmem:[%s4051_s0 + $0x28] sm:$0xff]  ;;  %v145_v12 = vld [vmem:[%s4051_s0 + $0x30] sm:$0xff]  ;;  %s3441_s4 = scalar_lea.vmem %s2700_s24, 128  ;;  %p3446_p3 = scmp.lt.s32.totalorder %s2700_s24, %s2700_s24 }
  0x4e   :  { %2937 = vmatpush3.msra.mxu1 %v3612_v4  ;;  %2927 = vmatprep.mubr.msk.f32.mxu1 %vm153_vm2, %v141_v5  ;;  %v146_v13 = vld [vmem:[%s4051_s0 + $0x38] sm:$0xff]  ;;  %v2711_v14 = vld [vmem:[%s4054_s3] ss:$0 sm:$0xff]  ;;  %s3483_s3 = smov 64   ;;  %p3442_p2 = scmp.ne.s32.totalorder %s2700_s24, %s3441_s4 }
  0x4f   :  { %2938 = vmatprep.subr.mxu1 %v3481_v0  ;;  %2960 = vmatprep.subr.mxu0 %v3481_v0  ;;  %p3447_p4 = scmp.lt.s32.totalorder %s3441_s4, %s3441_s4 }
  0x50   :  { %2939 = vmatpush3.msra.mxu1 %v3620_v6  ;;  %2961 = vmatpush3.msra.mxu0 %v3620_v6 }
  0x51   :  { %2928 = vmatmul.mubr.msk.f32.gmra.mxu1 %vm153_vm2, %v142_v7  ;;  %2940 = vmatprep.subr.mxu1 %v3481_v0  ;;  %p3448_p5 = por %p3447_p4, %p3446_p3 }
  0x52   :  { %2930 = vmatprep.mubr.msk.f32.mxu1 %vm153_vm2, %v143_v8  ;;  %2941 = vmatpush3.msra.mxu1 %v3631_v9 }
  0x53   :  { %2942 = vmatprep.subr.mxu1 %v3481_v0  ;;  %2962 = vmatprep.subr.mxu0 %v3481_v0  ;;  %p3449_p6 = pnand %p3448_p5, %p3442_p2 }
  0x54   :  { %2943 = vmatpush3.msra.mxu1 %v3638_v10  ;;  %2963 = vmatpush3.msra.mxu0 %v3631_v9 }
  0x55   :  { %2931 = vmatmul.mubr.msk.f32.gmra.mxu1 %vm153_vm2, %v144_v11  ;;  %2947 = vmatprep.subr.mxu1 %v3481_v0 }
  0x56   :  { %2933 = vmatprep.mubr.msk.f32.mxu1 %vm153_vm2, %v145_v12  ;;  %2964 = vmatprep.subr.mxu0 %v3481_v0 }
  0x57   :  { %2965 = vmatpush3.msra.mxu0 %v3638_v10 }
  0x58   :  { %2980 = vmatprep.subr.mxu0 %v3481_v0 }
  0x59   :  { %2934 = vmatmul.mubr.msk.f32.gmra.mxu1 %vm153_vm2, %v146_v13 }
  0x5a   :  { %2944 = vmatprep.mubr.msk.f32.mxu1 %vm3482_vm0, %v3481_v0 }
  0x5d   :  { %2945 = vmatmul.mubr.f32.vlgmr.msra.gmra.mxu1 %v3481_v0 }
  0x5e   :  { %2948 = vmatpush3.msra.mxu1 %v3612_v4  ;;  %2955 = vmatprep.mubr.msk.f32.mxu1 %vm3482_vm0, %v3481_v0 }
  0x5f   :  { %2949 = vmatprep.subr.mxu1 %v3481_v0 }
  0x60   :  { %2950 = vmatpush3.msra.mxu1 %v3620_v6 }
  0x61   :  { %2951 = vmatprep.subr.mxu1 %v3481_v0 }
  0x62   :  { %2952 = vmatpush3.msra.mxu1 %v3631_v9 }
  0x63   :  { %2953 = vmatprep.subr.mxu1 %v3481_v0 }
  0x64   :  { %2954 = vmatpush3.msra.mxu1 %v3638_v10 }
  0x65   :  { %2969 = vmatprep.subr.mxu1 %v3481_v0 }
 0x10d   :  { %v2926_v15 = vpop.f32.mrf.mxu1 }
 0x10e   :  { %v254_v16 = vadd.f32 %v2926_v15, %v2711_v14 }
 0x10f   :  { %v248_v17 = vpop.f32.mrf.mxu1 }
 0x110   :  { %v249_v29 = vadd.f32 %v2711_v14, %v248_v17 }
 0x111   :  { %v2929_v18 = vpop.f32.mrf.mxu1 }
 0x112   :  { %v3678_v19 = vadd.f32 %v2929_v18, %v2711_v14 }
 0x113   :  { %v258_v20 = vpop.f32.mrf.mxu1 }
 0x114   :  { %v3680_v21 = vadd.f32 %v2711_v14, %v258_v20 }
 0x115   :  { %v2932_v22 = vpop.f32.mrf.mxu1 }
 0x116   :  { %v3682_v23 = vadd.f32 %v2932_v22, %v2711_v14 }
 0x117   :  { %v268_v24 = vpop.f32.mrf.mxu1 }
 0x118   :  { %v3684_v25 = vadd.f32 %v2711_v14, %v268_v24 }
 0x119   :  { %v2935_v26 = vpop.f32.mrf.mxu1 }
 0x11a   :  { %v3686_v27 = vadd.f32 %v2935_v26, %v2711_v14 }
 0x11b   :  { %v278_v28 = vpop.f32.mrf.mxu1 }
 0x11c   :  { %v3688_v30 = vadd.f32 %v2711_v14, %v278_v28 }
 0x11d   :  { %v357_v31 = vpop.f32.mrf.mxu1 }
 0x11e   :  { %v361_v32 = vadd.f32 %v357_v31, %v249_v29 }
 0x11f   :  { %v2946_v33 = vpop.f32.mrf.mxu1 }
 0x120   :  { %3193 = vtanh.f32 %v361_v32  ;;  %v2721_v35 = vmul.f32 -1.442695, %v361_v32 }
 0x122   :  { %3195 = vpow2.f32 %v2721_v35 }
 0x12d   :  { %v3194_v34 = vpop.eup %3193 }
 0x12e   :  { %371 = vrot.lane.b32.xlu0 %v3194_v34, %s3483_s3 }
 0x12f   :  { %v3196_v36 = vpop.eup %3195 }
 0x130   :  { %v365_v37 = vadd.f32 1.0, %v3196_v36 }
 0x132   :  { %3197 = vrcp.f32 %v365_v37 }
 0x13f   :  { %v3198_v38 = vpop.eup %3197 }
 0x140   :  { %v369_v41 = vmul.f32 0.0, %v3198_v38 }
 0x1a0   :  { %v372_v39 = vpop.permute.xlu0 %371 }
 0x1a1   :  { %v374_v40 = vmul.f32 %v3198_v38, %v372_v39 }
 0x1a3   :  { %376 = vrot.lane.b32.xlu0 %v374_v40, %s3484_s5 }
 0x215   :  { %v377_v42 = vpop.permute.xlu0 %376 }
 0x216   :  { %v379_v43 = vadd.f32 %v377_v42, %v369_v41 }
 0x218   :  { %3199 = vtanh.f32 %v379_v43 }
 0x225   :  { %v3200_v44 = vpop.eup %3199 }
 0x226   :  { %382 = vrot.lane.b32.xlu1 %v3200_v44, %s3483_s3 }
 0x298   :  { %v383_v45 = vpop.permute.xlu1 %382 }
 0x299   :  { %v385_v46 = vmul.f32 %v3198_v38, %v383_v45 }
 0x29b   :  { %387 = vrot.lane.b32.xlu1 %v385_v46, %s3484_s5 }
 0x30d   :  { %v388_v47 = vpop.permute.xlu1 %387 }
 0x30e   :  { %390 = vst.msk [vmem:[#allocation2] sm:$0xff] %vm287_vm3, %v388_v47  ;;  %2956 = vmatmul.mubr.msk.f32.vlgmr.msra.gmra.mxu1 %vm287_vm3, %v388_v47 }
 0x30f   :  { %2970 = vmatpush3.msra.mxu1 %v3612_v4  ;;  %2977 = vmatprep.mubr.msk.f32.mxu1 %vm3482_vm0, %v3481_v0 }
 0x310   :  { %2971 = vmatprep.subr.mxu1 %v3481_v0 }
 0x311   :  { %2972 = vmatpush3.msra.mxu1 %v3620_v6 }
 0x312   :  { %2973 = vmatprep.subr.mxu1 %v3481_v0 }
 0x313   :  { %2974 = vmatpush3.msra.mxu1 %v3631_v9 }
 0x314   :  { %2975 = vmatprep.subr.mxu1 %v3481_v0 }
 0x315   :  { %2976 = vmatpush3.msra.mxu1 %v3638_v10 }
 0x316   :  { %2991 = vmatprep.subr.mxu1 %v3481_v0 }
 0x3ce   :  { %v459_v48 = vpop.f32.mrf.mxu1 }
 0x3cf   :  { %v463_v49 = vadd.f32 %v459_v48, %v254_v16 }
 0x3d0   :  { %v2957_v50 = vpop.f32.mrf.mxu1 }
 0x3d1   :  { %3201 = vtanh.f32 %v463_v49  ;;  %v2723_v52 = vmul.f32 -1.442695, %v463_v49 }
 0x3d3   :  { %3203 = vpow2.f32 %v2723_v52 }
 0x3de   :  { %v3202_v51 = vpop.eup %3201 }
 0x3df   :  { %473 = vrot.lane.b32.xlu0 %v3202_v51, %s3483_s3 }
 0x3e0   :  { %v3204_v53 = vpop.eup %3203 }
 0x3e1   :  { %v467_v54 = vadd.f32 1.0, %v3204_v53 }
 0x3e3   :  { %3205 = vrcp.f32 %v467_v54 }
 0x3f0   :  { %v3206_v55 = vpop.eup %3205 }
 0x3f1   :  { %v471_v58 = vmul.f32 %v3206_v55, %v379_v43 }
 0x451   :  { %v474_v56 = vpop.permute.xlu0 %473 }
 0x452   :  { %v476_v57 = vmul.f32 %v3206_v55, %v474_v56 }
 0x454   :  { %478 = vrot.lane.b32.xlu1 %v476_v57, %s3484_s5 }
 0x4c6   :  { %v479_v59 = vpop.permute.xlu1 %478 }
 0x4c7   :  { %v481_v60 = vadd.f32 %v479_v59, %v471_v58 }
 0x4c9   :  { %3207 = vtanh.f32 %v481_v60 }
 0x4d6   :  { %v3208_v61 = vpop.eup %3207 }
 0x4d7   :  { %484 = vrot.lane.b32.xlu0 %v3208_v61, %s3483_s3 }
 0x549   :  { %v485_v62 = vpop.permute.xlu0 %484 }
 0x54a   :  { %v487_v63 = vmul.f32 %v3206_v55, %v485_v62 }
 0x54c   :  { %489 = vrot.lane.b32.xlu1 %v487_v63, %s3484_s5 }
 0x5be   :  { %v490_v1 = vpop.permute.xlu1 %489 }
 0x5bf   :  { %493 = vst.msk [vmem:[#allocation2 + $0x8] sm:$0xff] %vm287_vm3, %v490_v1  ;;  %2967 = vmatmul.mubr.msk.f32.vlgmr.msra.gmra.mxu0 %vm287_vm3, %v490_v1 }
 0x5c0   :  { %2981 = vmatpush3.msra.mxu0 %v3612_v4  ;;  %2988 = vmatprep.mubr.msk.f32.mxu0 %vm3482_vm0, %v3481_v0 }
 0x5c1   :  { %2982 = vmatprep.subr.mxu0 %v3481_v0 }
 0x5c2   :  { %2983 = vmatpush3.msra.mxu0 %v3620_v6 }
 0x5c3   :  { %2984 = vmatprep.subr.mxu0 %v3481_v0 }
 0x5c4   :  { %2985 = vmatpush3.msra.mxu0 %v3631_v9 }
 0x5c5   :  { %2986 = vmatprep.subr.mxu0 %v3481_v0 }
 0x5c6   :  { %2987 = vmatpush3.msra.mxu0 %v3638_v10 }
 0x5c7   :  { %3002 = vmatprep.subr.mxu0 %v3481_v0 }
 0x67f   :  { %v562_v2 = vpop.f32.mrf.mxu0 }
 0x680   :  { %v566_v3 = vadd.f32 %v562_v2, %v3680_v21 }
 0x681   :  { %v2968_v5 = vpop.f32.mrf.mxu0 }
 0x682   :  { %3209 = vtanh.f32 %v566_v3  ;;  %v2725_v8 = vmul.f32 -1.442695, %v566_v3 }
 0x684   :  { %3211 = vpow2.f32 %v2725_v8 }
 0x68f   :  { %v3210_v7 = vpop.eup %3209 }
 0x690   :  { %576 = vrot.lane.b32.xlu0 %v3210_v7, %s3483_s3 }
 0x691   :  { %v3212_v11 = vpop.eup %3211 }
 0x692   :  { %v570_v12 = vadd.f32 1.0, %v3212_v11 }
 0x694   :  { %3213 = vrcp.f32 %v570_v12 }
 0x6a1   :  { %v3214_v13 = vpop.eup %3213 }
 0x6a2   :  { %v574_v16 = vmul.f32 %v3214_v13, %v481_v60 }
 0x702   :  { %v577_v14 = vpop.permute.xlu0 %576 }
 0x703   :  { %v579_v15 = vmul.f32 %v3214_v13, %v577_v14  ;;  %v1114_v14 = vld [vmem:[#allocation6 + $0x10] sm:$0xff] }
 0x705   :  { %581 = vrot.lane.b32.xlu1 %v579_v15, %s3484_s5  ;;  %v1121_v15 = vld [vmem:[#allocation2] sm:$0xff] }
 0x777   :  { %v582_v17 = vpop.permute.xlu1 %581 }
 0x778   :  { %v584_v18 = vadd.f32 %v582_v17, %v574_v16  ;;  %v1113_v16 = vld [vmem:[#allocation6 + $0x8] sm:$0xff]  ;;  %v1112_v17 = vld [vmem:[#allocation6] sm:$0xff] }
 0x77a   :  { %3215 = vtanh.f32 %v584_v18 }
 0x787   :  { %v3216_v20 = vpop.eup %3215 }
 0x788   :  { %587 = vrot.lane.b32.xlu0 %v3216_v20, %s3483_s3 }
 0x7fa   :  { %v588_v21 = vpop.permute.xlu0 %587 }
 0x7fb   :  { %v590_v22 = vmul.f32 %v3214_v13, %v588_v21 }
 0x7fd   :  { %592 = vrot.lane.b32.xlu1 %v590_v22, %s3484_s5 }
 0x86f   :  { %v593_v24 = vpop.permute.xlu1 %592 }
 0x870   :  { %596 = vst.msk [vmem:[#allocation2 + $0x10] sm:$0xff] %vm287_vm3, %v593_v24  ;;  %2978 = vmatmul.mubr.msk.f32.vlgmr.msra.gmra.mxu1 %vm287_vm3, %v593_v24 }
 0x871   :  { %2992 = vmatpush3.msra.mxu1 %v3612_v4  ;;  %2999 = vmatprep.mubr.msk.f32.mxu1 %vm3482_vm0, %v3481_v0 }
 0x872   :  { %2993 = vmatprep.subr.mxu1 %v3481_v0 }
 0x873   :  { %2994 = vmatpush3.msra.mxu1 %v3620_v6 }
 0x874   :  { %2995 = vmatprep.subr.mxu1 %v3481_v0 }
 0x875   :  { %2996 = vmatpush3.msra.mxu1 %v3631_v9 }
 0x876   :  { %2997 = vmatprep.subr.mxu1 %v3481_v0 }
 0x877   :  { %2998 = vmatpush3.msra.mxu1 %v3638_v10  ;;  %v1123_v20 = vld [vmem:[#allocation2 + $0x10] sm:$0xff] }
 0x878   :  { %3013 = vmatprep.subr.mxu1 %v3481_v0 }
 0x930   :  { %v665_v26 = vpop.f32.mrf.mxu1 }
 0x931   :  { %v669_v28 = vadd.f32 %v665_v26, %v3678_v19 }
 0x932   :  { %v2979_v29 = vpop.f32.mrf.mxu1 }
 0x933   :  { %3217 = vtanh.f32 %v669_v28  ;;  %v2727_v32 = vmul.f32 -1.442695, %v669_v28 }
 0x935   :  { %3219 = vpow2.f32 %v2727_v32 }
 0x940   :  { %v3218_v31 = vpop.eup %3217 }
 0x941   :  { %679 = vrot.lane.b32.xlu0 %v3218_v31, %s3483_s3 }
 0x942   :  { %v3220_v33 = vpop.eup %3219 }
 0x943   :  { %v673_v34 = vadd.f32 1.0, %v3220_v33 }
 0x945   :  { %3221 = vrcp.f32 %v673_v34 }
 0x952   :  { %v3222_v35 = vpop.eup %3221 }
 0x953   :  { %v677_v38 = vmul.f32 %v3222_v35, %v584_v18  ;;  %v1122_v18 = vld [vmem:[#allocation2 + $0x8] sm:$0xff] }
 0x9b3   :  { %v680_v36 = vpop.permute.xlu0 %679 }
 0x9b4   :  { %v682_v37 = vmul.f32 %v3222_v35, %v680_v36 }
 0x9b6   :  { %684 = vrot.lane.b32.xlu1 %v682_v37, %s3484_s5 }
 0xa28   :  { %v685_v39 = vpop.permute.xlu1 %684 }
 0xa29   :  { %v687_v40 = vadd.f32 %v685_v39, %v677_v38 }
 0xa2b   :  { %3223 = vtanh.f32 %v687_v40 }
 0xa38   :  { %v3224_v19 = vpop.eup %3223 }
 0xa39   :  { %690 = vrot.lane.b32.xlu0 %v3224_v19, %s3483_s3  ;;  %v3793_v19 = vld [vmem:[#allocation8 + $0x18] sm:$0xff] }
 0xaab   :  { %v691_v41 = vpop.permute.xlu0 %690 }
 0xaac   :  { %v693_v42 = vmul.f32 %v3222_v35, %v691_v41  ;;  %v3796_v41 = vld [vmem:[#allocation8 + $0x10] sm:$0xff] }
 0xaae   :  { %695 = vrot.lane.b32.xlu1 %v693_v42, %s3484_s5  ;;  %v3800_v42 = vld [vmem:[#allocation8 + $0x8] sm:$0xff] }
 0xb20   :  { %v696_v43 = vpop.permute.xlu1 %695 }
 0xb21   :  { %699 = vst.msk [vmem:[#allocation2 + $0x18] sm:$0xff] %vm287_vm3, %v696_v43  ;;  %2989 = vmatmul.mubr.msk.f32.vlgmr.msra.gmra.mxu0 %vm287_vm3, %v696_v43  ;;  %v3804_v43 = vld [vmem:[#allocation8] sm:$0xff] }
 0xb22   :  { %3003 = vmatpush3.msra.mxu0 %v3612_v4  ;;  %3010 = vmatprep.mubr.msk.f32.mxu0 %vm3482_vm0, %v3481_v0 }
 0xb23   :  { %3004 = vmatprep.subr.mxu0 %v3481_v0 }
 0xb24   :  { %3005 = vmatpush3.msra.mxu0 %v3620_v6 }
 0xb25   :  { %3006 = vmatprep.subr.mxu0 %v3481_v0 }
 0xb26   :  { %3007 = vmatpush3.msra.mxu0 %v3631_v9 }
 0xb27   :  { %3008 = vmatprep.subr.mxu0 %v3481_v0 }
 0xb28   :  { %3009 = vmatpush3.msra.mxu0 %v3638_v10  ;;  %v1124_v21 = vld [vmem:[#allocation2 + $0x18] sm:$0xff] }
 0xbe1   :  { %v768_v44 = vpop.f32.mrf.mxu0 }
 0xbe2   :  { %v772_v45 = vadd.f32 %v768_v44, %v3684_v25 }
 0xbe3   :  { %v2990_v46 = vpop.f32.mrf.mxu0 }
 0xbe4   :  { %3225 = vtanh.f32 %v772_v45  ;;  %v2729_v48 = vmul.f32 -1.442695, %v772_v45 }
 0xbe6   :  { %3227 = vpow2.f32 %v2729_v48 }
 0xbf1   :  { %v3226_v47 = vpop.eup %3225 }
 0xbf2   :  { %782 = vrot.lane.b32.xlu0 %v3226_v47, %s3483_s3 }
 0xbf3   :  { %v3228_v49 = vpop.eup %3227 }
 0xbf4   :  { %v776_v50 = vadd.f32 1.0, %v3228_v49 }
 0xbf6   :  { %3229 = vrcp.f32 %v776_v50 }
 0xc03   :  { %v3230_v51 = vpop.eup %3229 }
 0xc04   :  { %v780_v54 = vmul.f32 %v3230_v51, %v687_v40 }
 0xc64   :  { %v783_v52 = vpop.permute.xlu0 %782 }
 0xc65   :  { %v785_v53 = vmul.f32 %v3230_v51, %v783_v52 }
 0xc67   :  { %787 = vrot.lane.b32.xlu1 %v785_v53, %s3484_s5  ;;  %v3840_v53 = vld [vmem:[%s4057_s6] ss:$0 sm:$0xff] }
 0xcd9   :  { %v788_v55 = vpop.permute.xlu1 %787 }
 0xcda   :  { %v790_v56 = vadd.f32 %v788_v55, %v780_v54 }
 0xcdc   :  { %3231 = vtanh.f32 %v790_v56 }
 0xce9   :  { %v3232_v25 = vpop.eup %3231 }
 0xcea   :  { %793 = vrot.lane.b32.xlu0 %v3232_v25, %s3483_s3 }
 0xd5c   :  { %v794_v57 = vpop.permute.xlu0 %793 }
 0xd5d   :  { %v796_v58 = vmul.f32 %v3230_v51, %v794_v57 }
 0xd5f   :  { %798 = vrot.lane.b32.xlu1 %v796_v58, %s3484_s5 }
 0xdd1   :  { %v799_v59 = vpop.permute.xlu1 %798 }
 0xdd2   :  { %802 = vst.msk [vmem:[#allocation2 + $0x20] sm:$0xff] %vm287_vm3, %v799_v59  ;;  %3000 = vmatmul.mubr.msk.f32.vlgmr.msra.gmra.mxu1 %vm287_vm3, %v799_v59 }
 0xdd3   :  { %3014 = vmatpush3.msra.mxu1 %v3612_v4  ;;  %3021 = vmatprep.mubr.msk.f32.mxu1 %vm3482_vm0, %v3481_v0 }
 0xdd4   :  { %3015 = vmatprep.subr.mxu1 %v3481_v0 }
 0xdd5   :  { %3016 = vmatpush3.msra.mxu1 %v3620_v6 }
 0xdd6   :  { %3017 = vmatprep.subr.mxu1 %v3481_v0 }
 0xdd7   :  { %3018 = vmatpush3.msra.mxu1 %v3631_v9 }
 0xdd8   :  { %3019 = vmatprep.subr.mxu1 %v3481_v0 }
 0xdd9   :  { %3020 = vmatpush3.msra.mxu1 %v3638_v10  ;;  %v1125_v22 = vld [vmem:[#allocation2 + $0x20] sm:$0xff] }
 0xdda   :  { %3044 = vmatprep.subr.mxu1 %v3481_v0 }
 0xe92   :  { %v871_v60 = vpop.f32.mrf.mxu1 }
 0xe93   :  { %v875_v4 = vadd.f32 %v871_v60, %v3682_v23  ;;  %v1115_v23 = vld [vmem:[#allocation6 + $0x18] sm:$0xff] }
 0xe94   :  { %v3001_v61 = vpop.f32.mrf.mxu1  ;;  %3024 = vmatprep.subr.mxu0 %v1115_v23 }
 0xe95   :  { %3233 = vtanh.f32 %v875_v4  ;;  %v2731_v63 = vmul.f32 -1.442695, %v875_v4 }
 0xe97   :  { %3235 = vpow2.f32 %v2731_v63 }
 0xea2   :  { %v3234_v62 = vpop.eup %3233 }
 0xea3   :  { %885 = vrot.lane.b32.xlu0 %v3234_v62, %s3483_s3 }
 0xea4   :  { %v3236_v6 = vpop.eup %3235 }
 0xea5   :  { %v879_v1 = vadd.f32 1.0, %v3236_v6 }
 0xea7   :  { %3237 = vrcp.f32 %v879_v1 }
 0xeb4   :  { %v3238_v9 = vpop.eup %3237 }
 0xeb5   :  { %v883_v10 = vmul.f32 %v3238_v9, %v790_v56 }
 0xf15   :  { %v886_v2 = vpop.permute.xlu0 %885 }
 0xf16   :  { %v888_v3 = vmul.f32 %v3238_v9, %v886_v2 }
 0xf18   :  { %890 = vrot.lane.b32.xlu1 %v888_v3, %s3484_s5 }
 0xf8a   :  { %v891_v5 = vpop.permute.xlu1 %890 }
 0xf8b   :  { %v893_v7 = vadd.f32 %v891_v5, %v883_v10 }
 0xf8d   :  { %3239 = vtanh.f32 %v893_v7 }
 0xf9a   :  { %v3240_v8 = vpop.eup %3239 }
 0xf9b   :  { %896 = vrot.lane.b32.xlu0 %v3240_v8, %s3483_s3 }
0x100d   :  { %v897_v11 = vpop.permute.xlu0 %896 }
0x100e   :  { %v899_v12 = vmul.f32 %v3238_v9, %v897_v11 }
0x1010   :  { %901 = vrot.lane.b32.xlu1 %v899_v12, %s3484_s5 }
0x1082   :  { %v902_v13 = vpop.permute.xlu1 %901 }
0x1083   :  { %905 = vst.msk [vmem:[#allocation2 + $0x28] sm:$0xff] %vm287_vm3, %v902_v13  ;;  %3011 = vmatmul.mubr.msk.f32.vlgmr.msra.gmra.mxu0 %vm287_vm3, %v902_v13 }
0x1084   :  { %3025 = vmatpush3.msra.mxu0 %v1115_v23  ;;  %3032 = vmatprep.mubr.msk.f32.mxu0 %vm287_vm3, %v1121_v15 }
0x1085   :  { %3026 = vmatprep.subr.mxu0 %v1114_v14 }
0x1086   :  { %3027 = vmatpush3.msra.mxu0 %v1114_v14 }
0x1087   :  { %3028 = vmatprep.subr.mxu0 %v1113_v16 }
0x1088   :  { %3029 = vmatpush3.msra.mxu0 %v1113_v16 }
0x1089   :  { %3030 = vmatprep.subr.mxu0 %v1112_v17 }
0x108a   :  { %3031 = vmatpush3.msra.mxu0 %v1112_v17  ;;  %v1126_v24 = vld [vmem:[#allocation2 + $0x28] sm:$0xff] }
0x108b   :  { %3033 = vmatmul.mubr.msk.f32.vlgmr.msra.gmra.mxu0 %vm287_vm3, %v1122_v18  ;;  %3066 = vmatprep.subr.mxu0 %v3481_v0 }
0x108c   :  { %3035 = vmatprep.mubr.msk.f32.mxu0 %vm287_vm3, %v1123_v20  ;;  %3067 = vmatpush3.msra.mxu0 %v3793_v19 }
0x108d   :  { %3068 = vmatprep.subr.mxu0 %v3481_v0 }
0x108e   :  { %3069 = vmatpush3.msra.mxu0 %v3796_v41 }
0x108f   :  { %3036 = vmatmul.mubr.msk.f32.gmra.mxu0 %vm287_vm3, %v1124_v21  ;;  %3070 = vmatprep.subr.mxu0 %v3481_v0 }
0x1090   :  { %3038 = vmatprep.mubr.msk.f32.mxu0 %vm287_vm3, %v1125_v22  ;;  %3071 = vmatpush3.msra.mxu0 %v3800_v42 }
0x1091   :  { %3072 = vmatprep.subr.mxu0 %v3481_v0 }
0x1092   :  { %3073 = vmatpush3.msra.mxu0 %v3804_v43 }
0x1093   :  { %3039 = vmatmul.mubr.msk.f32.gmra.mxu0 %vm287_vm3, %v1126_v24  ;;  %3088 = vmatprep.subr.mxu0 %v3481_v0 }
0x1143   :  { %v974_v26 = vpop.f32.mrf.mxu0 }
0x1144   :  { %v978_v28 = vadd.f32 %v974_v26, %v3688_v30 }
0x1145   :  { %v3012_v29 = vpop.f32.mrf.mxu0 }
0x1146   :  { %3241 = vtanh.f32 %v978_v28  ;;  %v2733_v32 = vmul.f32 -1.442695, %v978_v28 }
0x1148   :  { %3243 = vpow2.f32 %v2733_v32 }
0x114b   :  { %v3834_v48 = vpop.f32.mrf.mxu0 }
0x114c   :  { %v1231_v20 = vadd.f32 %v3834_v48, %v3840_v53 }
0x114d   :  { %v1225_v52 = vpop.f32.mrf.mxu0 }
0x114e   :  { %v1226_v54 = vadd.f32 %v3840_v53, %v1225_v52 }
0x1153   :  { %v3242_v31 = vpop.eup %3241 }
0x1154   :  { %988 = vrot.lane.b32.xlu0 %v3242_v31, %s3483_s3 }
0x1155   :  { %v3244_v33 = vpop.eup %3243 }
0x1156   :  { %v982_v34 = vadd.f32 1.0, %v3244_v33 }
0x1158   :  { %3245 = vrcp.f32 %v982_v34 }
0x1165   :  { %v3246_v35 = vpop.eup %3245 }
0x1166   :  { %v986_v38 = vmul.f32 %v3246_v35, %v893_v7 }
0x11c6   :  { %v989_v36 = vpop.permute.xlu0 %988 }
0x11c7   :  { %v991_v37 = vmul.f32 %v3246_v35, %v989_v36 }
0x11c9   :  { %993 = vrot.lane.b32.xlu1 %v991_v37, %s3484_s5 }
0x123b   :  { %v994_v39 = vpop.permute.xlu1 %993 }
0x123c   :  { %v3789_v40 = vadd.f32 %v994_v39, %v986_v38 }
0x123e   :  { %3247 = vtanh.f32 %v3789_v40 }
0x124b   :  { %v3248_v30 = vpop.eup %3247 }
0x124c   :  { %999 = vrot.lane.b32.xlu0 %v3248_v30, %s3483_s3 }
0x12be   :  { %v1000_v44 = vpop.permute.xlu0 %999 }
0x12bf   :  { %v1002_v45 = vmul.f32 %v3246_v35, %v1000_v44 }
0x12c1   :  { %1004 = vrot.lane.b32.xlu1 %v1002_v45, %s3484_s5 }
0x1333   :  { %v1005_v46 = vpop.permute.xlu1 %1004 }
0x1334   :  { %1008 = vst.msk [vmem:[#allocation2 + $0x30] sm:$0xff] %vm287_vm3, %v1005_v46  ;;  %3022 = vmatmul.mubr.msk.f32.vlgmr.msra.gmra.mxu1 %vm287_vm3, %v1005_v46  ;;  %v3037_v46 = vpop.f32.mrf.mxu0 }
0x1335   :  { %3045 = vmatpush3.msra.mxu1 %v3793_v19  ;;  %3052 = vmatprep.mubr.msk.f32.mxu1 %vm3482_vm0, %v3481_v0 }
0x1336   :  { %3046 = vmatprep.subr.mxu1 %v3481_v0 }
0x1337   :  { %3047 = vmatpush3.msra.mxu1 %v3796_v41 }
0x1338   :  { %3048 = vmatprep.subr.mxu1 %v3481_v0 }
0x1339   :  { %3049 = vmatpush3.msra.mxu1 %v3800_v42 }
0x133a   :  { %3050 = vmatprep.subr.mxu1 %v3481_v0 }
0x133b   :  { %3051 = vmatpush3.msra.mxu1 %v3804_v43  ;;  %v1127_v47 = vld [vmem:[#allocation2 + $0x30] sm:$0xff] }
0x133c   :  { %3053 = vmatmul.mubr.f32.vlgmr.msra.gmra.mxu1 %v3481_v0  ;;  %3041 = vmatprep.mubr.msk.f32.mxu0 %vm287_vm3, %v1127_v47  ;;  %v1235_v47 = vpop.f32.mrf.mxu0 }
0x133d   :  { %3055 = vmatprep.subr.mxu1 %v3481_v0  ;;  %3063 = vmatprep.mubr.msk.f32.mxu1 %vm3482_vm0, %v3481_v0  ;;  %v1236_v52 = vadd.f32 %v3840_v53, %v1235_v47 }
0x133e   :  { %3056 = vmatpush3.msra.mxu1 %v3793_v19  ;;  %v3884_v48 = vpop.f32.mrf.mxu0 }
0x133f   :  { %3057 = vmatprep.subr.mxu1 %v3481_v0 }
0x1340   :  { %3058 = vmatpush3.msra.mxu1 %v3796_v41 }
0x1341   :  { %3059 = vmatprep.subr.mxu1 %v3481_v0 }
0x1342   :  { %3060 = vmatpush3.msra.mxu1 %v3800_v42 }
0x1343   :  { %3061 = vmatprep.subr.mxu1 %v3481_v0 }
0x1344   :  { %3062 = vmatpush3.msra.mxu1 %v3804_v43 }
0x1345   :  { %3077 = vmatprep.subr.mxu1 %v3481_v0 }
0x13f4   :  { %v1077_v49 = vpop.f32.mrf.mxu1 }
0x13f5   :  { %v1081_v50 = vadd.f32 %v1077_v49, %v3686_v27  ;;  %v3886_v49 = vpop.f32.mrf.mxu0 }
0x13f6   :  { %v3023_v51 = vpop.f32.mrf.mxu1 }
0x13f7   :  { %v2735_v2 = vmul.f32 -1.442695, %v1081_v50 }
0x13fc   :  { %v1330_v55 = vpop.f32.mrf.mxu1 }
0x13fd   :  { %v1334_v56 = vadd.f32 %v1330_v55, %v1226_v54 }
0x13fe   :  { %v3054_v25 = vpop.f32.mrf.mxu1 }
0x13ff   :  { %3249 = vtanh.f32 %v1334_v56  ;;  %v2745_v58 = vmul.f32 -1.442695, %v1334_v56 }
0x1401   :  { %3251 = vpow2.f32 %v2745_v58 }
0x140c   :  { %v3250_v57 = vpop.eup %3249 }
0x140d   :  { %1344 = vrot.lane.b32.xlu0 %v3250_v57, %s3483_s3 }
0x140e   :  { %v3252_v59 = vpop.eup %3251 }
0x140f   :  { %v1338_v27 = vadd.f32 1.0, %v3252_v59 }
0x1411   :  { %3253 = vrcp.f32 %v1338_v27 }
0x141e   :  { %v3254_v60 = vpop.eup %3253 }
0x141f   :  { %v1342_v62 = vmul.f32 0.0, %v3254_v60 }
0x147f   :  { %v1345_v4 = vpop.permute.xlu0 %1344 }
0x1480   :  { %v1347_v61 = vmul.f32 %v3254_v60, %v1345_v4 }
0x1482   :  { %1349 = vrot.lane.b32.xlu1 %v1347_v61, %s3484_s5 }
0x14f4   :  { %v1350_v63 = vpop.permute.xlu1 %1349 }
0x14f5   :  { %v1352_v6 = vadd.f32 %v1350_v63, %v1342_v62 }
0x14f7   :  { %3255 = vtanh.f32 %v1352_v6 }
0x14f8   :  { %3257 = vtanh.f32 %v1081_v50 }
0x14f9   :  { %3259 = vpow2.f32 %v2735_v2 }
0x1504   :  { %v3256_v1 = vpop.eup %3255 }
0x1505   :  { %1355 = vrot.lane.b32.xlu0 %v3256_v1, %s3483_s3  ;;  %v3258_v9 = vpop.eup %3257 }
0x1506   :  { %v3260_v3 = vpop.eup %3259 }
0x1507   :  { %v1085_v10 = vadd.f32 1.0, %v3260_v3  ;;  %v1241_v3 = vadd.f32 %v3037_v46, %v3840_v53 }
0x1509   :  { %1091 = vrot.lane.b32.xlu0 %v3258_v9, %s3483_s3  ;;  %3261 = vrcp.f32 %v1085_v10 }
0x1516   :  { %v3262_v23 = vpop.eup %3261 }
0x1517   :  { %v1089_v13 = vmul.f32 %v3262_v23, %v3789_v40 }
0x1577   :  { %v1356_v5 = vpop.permute.xlu0 %1355 }
0x1578   :  { %v1358_v7 = vmul.f32 %v3254_v60, %v1356_v5 }
0x157a   :  { %1360 = vrot.lane.b32.xlu1 %v1358_v7, %s3484_s5 }
0x157b   :  { %v1092_v8 = vpop.permute.xlu0 %1091 }
0x157c   :  { %v1094_v11 = vmul.f32 %v3262_v23, %v1092_v8 }
0x157e   :  { %1096 = vrot.lane.b32.xlu0 %v1094_v11, %s3484_s5 }
0x15ec   :  { %v1361_v12 = vpop.permute.xlu1 %1360 }
0x15ed   :  { %3064 = vmatmul.mubr.msk.f32.vlgmr.msra.gmra.mxu1 %vm287_vm3, %v1361_v12 }
0x15ee   :  { %3078 = vmatpush3.msra.mxu1 %v3793_v19  ;;  %3085 = vmatprep.mubr.msk.f32.mxu1 %vm3482_vm0, %v3481_v0 }
0x15ef   :  { %3079 = vmatprep.subr.mxu1 %v3481_v0 }
0x15f0   :  { %v1097_v14 = vpop.permute.xlu0 %1096  ;;  %3080 = vmatpush3.msra.mxu1 %v3796_v41 }
0x15f1   :  { %v1099_v15 = vadd.f32 %v1097_v14, %v1089_v13  ;;  %3081 = vmatprep.subr.mxu1 %v3481_v0 }
0x15f2   :  { %3082 = vmatpush3.msra.mxu1 %v3800_v42 }
0x15f3   :  { %3263 = vtanh.f32 %v1099_v15  ;;  %3083 = vmatprep.subr.mxu1 %v3481_v0 }
0x15f4   :  { %3084 = vmatpush3.msra.mxu1 %v3804_v43 }
0x15f5   :  { %3099 = vmatprep.subr.mxu1 %v3481_v0 }
0x1600   :  { %v3264_v16 = vpop.eup %3263 }
0x1601   :  { %1102 = vrot.lane.b32.xlu0 %v3264_v16, %s3483_s3 }
0x1673   :  { %v1103_v17 = vpop.permute.xlu0 %1102 }
0x1674   :  { %v1105_v18 = vmul.f32 %v3262_v23, %v1103_v17 }
0x1676   :  { %1107 = vrot.lane.b32.xlu0 %v1105_v18, %s3484_s5 }
0x16ad   :  { %v1430_v21 = vpop.f32.mrf.mxu1 }
0x16ae   :  { %v1434_v22 = vadd.f32 %v1430_v21, %v1231_v20 }
0x16af   :  { %v3065_v24 = vpop.f32.mrf.mxu1 }
0x16b0   :  { %3265 = vtanh.f32 %v1434_v22  ;;  %v2747_v31 = vmul.f32 -1.442695, %v1434_v22 }
0x16b2   :  { %3267 = vpow2.f32 %v2747_v31 }
0x16bd   :  { %v3266_v26 = vpop.eup %3265 }
0x16be   :  { %1444 = vrot.lane.b32.xlu1 %v3266_v26, %s3483_s3  ;;  %v1246_v26 = vadd.f32 %v3840_v53, %v3886_v49 }
0x16bf   :  { %v3268_v32 = vpop.eup %3267 }
0x16c0   :  { %v1438_v33 = vadd.f32 1.0, %v3268_v32 }
0x16c2   :  { %3269 = vrcp.f32 %v1438_v33 }
0x16cf   :  { %v3270_v34 = vpop.eup %3269 }
0x16d0   :  { %v1442_v37 = vmul.f32 %v3270_v34, %v1352_v6 }
0x16e8   :  { %v1108_v28 = vpop.permute.xlu0 %1107 }
0x16e9   :  { %1111 = vst.msk [vmem:[#allocation2 + $0x38] sm:$0xff] %vm287_vm3, %v1108_v28 }
0x16f0   :  { %v1128_v29 = vld [vmem:[#allocation2 + $0x38] sm:$0xff] }
0x16f1   :  { %3042 = vmatmul.mubr.msk.f32.gmra.mxu0 %vm287_vm3, %v1128_v29 }
0x16f2   :  { %3074 = vmatprep.mubr.msk.f32.mxu0 %vm3482_vm0, %v3481_v0 }
0x1730   :  { %v1445_v35 = vpop.permute.xlu1 %1444 }
0x1731   :  { %v1447_v36 = vmul.f32 %v3270_v34, %v1445_v35 }
0x1733   :  { %1449 = vrot.lane.b32.xlu1 %v1447_v36, %s3484_s5 }
0x17a5   :  { %v1450_v38 = vpop.permute.xlu1 %1449 }
0x17a6   :  { %v1452_v39 = vadd.f32 %v1450_v38, %v1442_v37 }
0x17a8   :  { %3271 = vtanh.f32 %v1452_v39 }
0x17b1   :  { %v3888_v50 = vpop.f32.mrf.mxu0 }
0x17b3   :  { %v3890_v51 = vpop.f32.mrf.mxu0 }
0x17b5   :  { %v3272_v40 = vpop.eup %3271 }
0x17b6   :  { %1455 = vrot.lane.b32.xlu1 %v3272_v40, %s3483_s3 }
0x1828   :  { %v1456_v30 = vpop.permute.xlu1 %1455 }
0x1829   :  { %v1458_v44 = vmul.f32 %v3270_v34, %v1456_v30 }
0x182b   :  { %1460 = vrot.lane.b32.xlu1 %v1458_v44, %s3484_s5 }
0x189d   :  { %v1461_v45 = vpop.permute.xlu1 %1460 }
0x189e   :  { %3075 = vmatmul.mubr.msk.f32.vlgmr.msra.gmra.mxu0 %vm287_vm3, %v1461_v45 }
0x189f   :  { %3089 = vmatpush3.msra.mxu0 %v3793_v19  ;;  %3096 = vmatprep.mubr.msk.f32.mxu0 %vm3482_vm0, %v3481_v0 }
0x18a0   :  { %3090 = vmatprep.subr.mxu0 %v3481_v0 }
0x18a1   :  { %3091 = vmatpush3.msra.mxu0 %v3796_v41 }
0x18a2   :  { %3092 = vmatprep.subr.mxu0 %v3481_v0 }
0x18a3   :  { %3093 = vmatpush3.msra.mxu0 %v3800_v42 }
0x18a4   :  { %3094 = vmatprep.subr.mxu0 %v3481_v0 }
0x18a5   :  { %3095 = vmatpush3.msra.mxu0 %v3804_v43 }
0x18a6   :  { %3110 = vmatprep.subr.mxu0 %v3481_v0 }
0x195e   :  { %v1530_v54 = vpop.f32.mrf.mxu0 }
0x195f   :  { %v1534_v55 = vadd.f32 %v1530_v54, %v1236_v52 }
0x1960   :  { %v3076_v56 = vpop.f32.mrf.mxu0 }
0x1961   :  { %3273 = vtanh.f32 %v1534_v55  ;;  %v2749_v57 = vmul.f32 -1.442695, %v1534_v55 }
0x1963   :  { %3275 = vpow2.f32 %v2749_v57 }
0x196e   :  { %v3274_v25 = vpop.eup %3273 }
0x196f   :  { %1544 = vrot.lane.b32.xlu0 %v3274_v25, %s3483_s3 }
0x1970   :  { %v3276_v58 = vpop.eup %3275 }
0x1971   :  { %v1538_v59 = vadd.f32 1.0, %v3276_v58 }
0x1973   :  { %3277 = vrcp.f32 %v1538_v59 }
0x1980   :  { %v3278_v27 = vpop.eup %3277 }
0x1981   :  { %v1542_v61 = vmul.f32 %v3278_v27, %v1452_v39 }
0x19e1   :  { %v1545_v60 = vpop.permute.xlu0 %1544 }
0x19e2   :  { %v1547_v4 = vmul.f32 %v3278_v27, %v1545_v60 }
0x19e4   :  { %1549 = vrot.lane.b32.xlu1 %v1547_v4, %s3484_s5 }
0x1a56   :  { %v1550_v62 = vpop.permute.xlu1 %1549 }
0x1a57   :  { %v1552_v63 = vadd.f32 %v1550_v62, %v1542_v61  ;;  %v1256_v62 = vadd.f32 %v3840_v53, %v3890_v51 }
0x1a59   :  { %3279 = vtanh.f32 %v1552_v63 }
0x1a66   :  { %v3280_v6 = vpop.eup %3279 }
0x1a67   :  { %1555 = vrot.lane.b32.xlu0 %v3280_v6, %s3483_s3 }
0x1ad9   :  { %v1556_v1 = vpop.permute.xlu0 %1555 }
0x1ada   :  { %v1558_v9 = vmul.f32 %v3278_v27, %v1556_v1 }
0x1adc   :  { %1560 = vrot.lane.b32.xlu1 %v1558_v9, %s3484_s5 }
0x1b4e   :  { %v1561_v2 = vpop.permute.xlu1 %1560 }
0x1b4f   :  { %3086 = vmatmul.mubr.msk.f32.vlgmr.msra.gmra.mxu1 %vm287_vm3, %v1561_v2 }
0x1b50   :  { %3100 = vmatpush3.msra.mxu1 %v3793_v19  ;;  %3107 = vmatprep.mubr.msk.f32.mxu1 %vm3482_vm0, %v3481_v0 }
0x1b51   :  { %3101 = vmatprep.subr.mxu1 %v3481_v0 }
0x1b52   :  { %3102 = vmatpush3.msra.mxu1 %v3796_v41 }
0x1b53   :  { %3103 = vmatprep.subr.mxu1 %v3481_v0 }
0x1b54   :  { %3104 = vmatpush3.msra.mxu1 %v3800_v42 }
0x1b55   :  { %3105 = vmatprep.subr.mxu1 %v3481_v0 }
0x1b56   :  { %3106 = vmatpush3.msra.mxu1 %v3804_v43 }
0x1b57   :  { %3121 = vmatprep.subr.mxu1 %v3481_v0 }
0x1c0f   :  { %v1630_v10 = vpop.f32.mrf.mxu1 }
0x1c10   :  { %v1634_v5 = vadd.f32 %v1630_v10, %v1241_v3 }
0x1c11   :  { %v3087_v7 = vpop.f32.mrf.mxu1 }
0x1c12   :  { %3281 = vtanh.f32 %v1634_v5  ;;  %v2751_v8 = vmul.f32 -1.442695, %v1634_v5 }
0x1c14   :  { %3283 = vpow2.f32 %v2751_v8 }
0x1c1f   :  { %v3282_v23 = vpop.eup %3281 }
0x1c20   :  { %1644 = vrot.lane.b32.xlu0 %v3282_v23, %s3483_s3 }
0x1c21   :  { %v3284_v11 = vpop.eup %3283 }
0x1c22   :  { %v1638_v12 = vadd.f32 1.0, %v3284_v11 }
0x1c24   :  { %3285 = vrcp.f32 %v1638_v12 }
0x1c31   :  { %v3286_v13 = vpop.eup %3285 }
0x1c32   :  { %v1642_v16 = vmul.f32 %v3286_v13, %v1552_v63 }
0x1c92   :  { %v1645_v14 = vpop.permute.xlu0 %1644 }
0x1c93   :  { %v1647_v15 = vmul.f32 %v3286_v13, %v1645_v14 }
0x1c95   :  { %1649 = vrot.lane.b32.xlu1 %v1647_v15, %s3484_s5 }
0x1d07   :  { %v1650_v17 = vpop.permute.xlu1 %1649 }
0x1d08   :  { %v1652_v18 = vadd.f32 %v1650_v17, %v1642_v16  ;;  %v1261_v16 = vadd.f32 %v3888_v50, %v3840_v53  ;;  %v2069_v50 = vld [vmem:[%s4058_s7 + $0x50] sm:$0xff] }
0x1d0a   :  { %3287 = vtanh.f32 %v1652_v18 }
0x1d17   :  { %v3288_v20 = vpop.eup %3287 }
0x1d18   :  { %1655 = vrot.lane.b32.xlu0 %v3288_v20, %s3483_s3 }
0x1d8a   :  { %v1656_v21 = vpop.permute.xlu0 %1655 }
0x1d8b   :  { %v1658_v22 = vmul.f32 %v3286_v13, %v1656_v21 }
0x1d8d   :  { %1660 = vrot.lane.b32.xlu1 %v1658_v22, %s3484_s5 }
0x1dff   :  { %v1661_v24 = vpop.permute.xlu1 %1660 }
0x1e00   :  { %3097 = vmatmul.mubr.msk.f32.vlgmr.msra.gmra.mxu0 %vm287_vm3, %v1661_v24 }
0x1e01   :  { %3111 = vmatpush3.msra.mxu0 %v3793_v19  ;;  %3118 = vmatprep.mubr.msk.f32.mxu0 %vm3482_vm0, %v3481_v0 }
0x1e02   :  { %3112 = vmatprep.subr.mxu0 %v3481_v0 }
0x1e03   :  { %3113 = vmatpush3.msra.mxu0 %v3796_v41 }
0x1e04   :  { %3114 = vmatprep.subr.mxu0 %v3481_v0 }
0x1e05   :  { %3115 = vmatpush3.msra.mxu0 %v3800_v42 }
0x1e06   :  { %3116 = vmatprep.subr.mxu0 %v3481_v0 }
0x1e07   :  { %3117 = vmatpush3.msra.mxu0 %v3804_v43 }
0x1e08   :  { %2264 = vmatprep.subr.mxu0 %v2069_v50  ;;  %v2144_v50 = vld [vmem:[#allocation9 + $0x240] sm:$0xff] }
0x1ec0   :  { %v1730_v28 = vpop.f32.mrf.mxu0 }
0x1ec1   :  { %v1734_v29 = vadd.f32 %v1730_v28, %v1246_v26 }
0x1ec2   :  { %v3098_v31 = vpop.f32.mrf.mxu0 }
0x1ec3   :  { %3289 = vtanh.f32 %v1734_v29  ;;  %v2753_v33 = vmul.f32 -1.442695, %v1734_v29 }
0x1ec5   :  { %3291 = vpow2.f32 %v2753_v33 }
0x1ed0   :  { %v3290_v32 = vpop.eup %3289 }
0x1ed1   :  { %1744 = vrot.lane.b32.xlu0 %v3290_v32, %s3483_s3 }
0x1ed2   :  { %v3292_v34 = vpop.eup %3291 }
0x1ed3   :  { %v1738_v35 = vadd.f32 1.0, %v3292_v34  ;;  %v2068_v34 = vld [vmem:[%s4058_s7 + $0x48] sm:$0xff] }
0x1ed5   :  { %3293 = vrcp.f32 %v1738_v35  ;;  %v2070_v35 = vld [vmem:[%s4058_s7 + $0x58] sm:$0xff] }
0x1ee2   :  { %v3294_v36 = vpop.eup %3293 }
0x1ee3   :  { %v1742_v39 = vmul.f32 %v3294_v36, %v1652_v18 }
0x1f43   :  { %v1745_v37 = vpop.permute.xlu0 %1744 }
0x1f44   :  { %v1747_v38 = vmul.f32 %v3294_v36, %v1745_v37  ;;  %v2065_v37 = vld [vmem:[%s4058_s7 + $0x30] sm:$0xff] }
0x1f46   :  { %1749 = vrot.lane.b32.xlu1 %v1747_v38, %s3484_s5  ;;  %v2067_v38 = vld [vmem:[%s4058_s7 + $0x40] sm:$0xff] }
0x1fb8   :  { %v1750_v40 = vpop.permute.xlu1 %1749 }
0x1fb9   :  { %v1752_v30 = vadd.f32 %v1750_v40, %v1742_v39  ;;  %v2063_v39 = vld [vmem:[%s4058_s7 + $0x20] sm:$0xff]  ;;  %v2064_v40 = vld [vmem:[%s4058_s7 + $0x28] sm:$0xff] }
0x1fbb   :  { %3295 = vtanh.f32 %v1752_v30 }
0x1fc8   :  { %v3296_v44 = vpop.eup %3295 }
0x1fc9   :  { %1755 = vrot.lane.b32.xlu0 %v3296_v44, %s3483_s3  ;;  %v2060_v44 = vld [vmem:[%s4058_s7 + $0x8] sm:$0xff] }
0x203b   :  { %v1756_v45 = vpop.permute.xlu0 %1755 }
0x203c   :  { %v1758_v46 = vmul.f32 %v3294_v36, %v1756_v45  ;;  %v2066_v36 = vld [vmem:[%s4058_s7 + $0x38] sm:$0xff]  ;;  %v2061_v45 = vld [vmem:[%s4058_s7 + $0x10] sm:$0xff] }
0x203e   :  { %1760 = vrot.lane.b32.xlu1 %v1758_v46, %s3484_s5  ;;  %v2059_v46 = vld [vmem:[%s4058_s7] sm:$0xff] }
0x20b0   :  { %v1761_v47 = vpop.permute.xlu1 %1760 }
0x20b1   :  { %3108 = vmatmul.mubr.msk.f32.vlgmr.msra.gmra.mxu1 %vm287_vm3, %v1761_v47 }
0x20b2   :  { %3122 = vmatpush3.msra.mxu1 %v3793_v19  ;;  %3129 = vmatprep.mubr.msk.f32.mxu1 %vm3482_vm0, %v3481_v0  ;;  %v1251_v19 = vadd.f32 %v3884_v48, %v3840_v53 }
0x20b3   :  { %3123 = vmatprep.subr.mxu1 %v3481_v0 }
0x20b4   :  { %3124 = vmatpush3.msra.mxu1 %v3796_v41 }
0x20b5   :  { %3125 = vmatprep.subr.mxu1 %v3481_v0 }
0x20b6   :  { %3126 = vmatpush3.msra.mxu1 %v3800_v42 }
0x20b7   :  { %3127 = vmatprep.subr.mxu1 %v3481_v0 }
0x20b8   :  { %3128 = vmatpush3.msra.mxu1 %v3804_v43 }
0x20b9   :  { %3132 = vmatprep.subr.mxu1 %v3481_v0 }
0x2171   :  { %v1830_v49 = vpop.f32.mrf.mxu1 }
0x2172   :  { %v1834_v52 = vadd.f32 %v1830_v49, %v1251_v19  ;;  %v2103_v19 = vld [vmem:[#allocation9 + $0xf8] sm:$0xff] }
0x2173   :  { %v3109_v54 = vpop.f32.mrf.mxu1 }
0x2174   :  { %3297 = vtanh.f32 %v1834_v52  ;;  %v2755_v41 = vmul.f32 -1.442695, %v1834_v52  ;;  %v2167_v54 = vld [vmem:[#allocation9 + $0x2f8] sm:$0xff] }
0x2176   :  { %3299 = vpow2.f32 %v2755_v41  ;;  %v2166_v41 = vld [vmem:[#allocation9 + $0x2f0] sm:$0xff] }
0x2181   :  { %v3298_v55 = vpop.eup %3297 }
0x2182   :  { %1844 = vrot.lane.b32.xlu0 %v3298_v55, %s3483_s3  ;;  %v2102_v55 = vld [vmem:[#allocation9 + $0xf0] sm:$0xff] }
0x2183   :  { %v3300_v56 = vpop.eup %3299 }
0x2184   :  { %v1838_v42 = vadd.f32 1.0, %v3300_v56 }
0x2186   :  { %3301 = vrcp.f32 %v1838_v42  ;;  %v2101_v42 = vld [vmem:[#allocation9 + $0xe8] sm:$0xff] }
0x2193   :  { %v3302_v25 = vpop.eup %3301 }
0x2194   :  { %v1842_v58 = vmul.f32 %v3302_v25, %v1752_v30  ;;  %v2062_v30 = vld [vmem:[%s4058_s7 + $0x18] sm:$0xff] }
0x21f4   :  { %v1845_v57 = vpop.permute.xlu0 %1844 }
0x21f5   :  { %v1847_v43 = vmul.f32 %v3302_v25, %v1845_v57  ;;  %v2100_v57 = vld [vmem:[#allocation9 + $0xe0] sm:$0xff] }
0x21f7   :  { %1849 = vrot.lane.b32.xlu1 %v1847_v43, %s3484_s5  ;;  %v2164_v43 = vld [vmem:[#allocation9 + $0x2e0] sm:$0xff] }
0x2269   :  { %v1850_v59 = vpop.permute.xlu1 %1849 }
0x226a   :  { %v1852_v48 = vadd.f32 %v1850_v59, %v1842_v58  ;;  %v2099_v58 = vld [vmem:[#allocation9 + $0xd8] sm:$0xff] }
0x226b   :  { %v2163_v59 = vld [vmem:[#allocation9 + $0x2d8] sm:$0xff] }
0x226c   :  { %3303 = vtanh.f32 %v1852_v48 }
0x2279   :  { %v3304_v27 = vpop.eup %3303 }
0x227a   :  { %1855 = vrot.lane.b32.xlu0 %v3304_v27, %s3483_s3  ;;  %v2162_v27 = vld [vmem:[#allocation9 + $0x2d0] sm:$0xff] }
0x22ec   :  { %v1856_v60 = vpop.permute.xlu0 %1855 }
0x22ed   :  { %v1858_v4 = vmul.f32 %v3302_v25, %v1856_v60  ;;  %v2165_v25 = vld [vmem:[#allocation9 + $0x2e8] sm:$0xff] }
0x22ee   :  { %v2097_v60 = vld [vmem:[#allocation9 + $0xc8] sm:$0xff] }
0x22ef   :  { %1860 = vrot.lane.b32.xlu1 %v1858_v4, %s3484_s5  ;;  %v2161_v4 = vld [vmem:[#allocation9 + $0x2c8] sm:$0xff] }
0x2361   :  { %v1861_v61 = vpop.permute.xlu1 %1860 }
0x2362   :  { %3119 = vmatmul.mubr.msk.f32.vlgmr.msra.gmra.mxu0 %vm287_vm3, %v1861_v61  ;;  %v2096_v61 = vld [vmem:[#allocation9 + $0xc0] sm:$0xff] }
0x2363   :  { %2304 = vmatprep.mubr.f32.mxu0 %v3481_v0  ;;  %2265 = vmatpush1.msra.mxu0 %v2068_v34  ;;  %v2079_v34 = vld [vmem:[#allocation9 + $0x38] sm:$0xff] }
0x2364   :  { %2266 = vmatprep.subr.mxu0 %v2066_v36  ;;  %v2078_v36 = vld [vmem:[#allocation9 + $0x30] sm:$0xff] }
0x2365   :  { %2267 = vmatpush1.msra.mxu0 %v2065_v37  ;;  %v2142_v37 = vld [vmem:[#allocation9 + $0x230] sm:$0xff] }
0x2366   :  { %2268 = vmatprep.subr.mxu0 %v2063_v39  ;;  %v2141_v39 = vld [vmem:[#allocation9 + $0x228] sm:$0xff] }
0x2367   :  { %2269 = vmatpush1.msra.mxu0 %v2062_v30  ;;  %v2075_v30 = vld [vmem:[#allocation9 + $0x18] sm:$0xff] }
0x2368   :  { %2270 = vmatprep.subr.mxu0 %v2060_v44  ;;  %v2074_v44 = vld [vmem:[#allocation9 + $0x10] sm:$0xff] }
0x2369   :  { %2271 = vmatpush1.msra.mxu0 %v2059_v46  ;;  %v2072_v46 = vld [vmem:[#allocation9] sm:$0xff] }
0x236a   :  { %2395 = vmatprep.subr.mxu0 %v2103_v19  ;;  %v2134_v19 = vld [vmem:[#allocation9 + $0x1f0] sm:$0xff] }
0x2422   :  { %v1930_v63 = vpop.f32.mrf.mxu0 }
0x2423   :  { %v1934_v6 = vadd.f32 %v1930_v63, %v1256_v62  ;;  %v2160_v62 = vld [vmem:[#allocation9 + $0x2c0] sm:$0xff]  ;;  %v2095_v63 = vld [vmem:[#allocation9 + $0xb8] sm:$0xff] }
0x2424   :  { %v3120_v1 = vpop.f32.mrf.mxu0 }
0x2425   :  { %3305 = vtanh.f32 %v1934_v6  ;;  %v2757_v2 = vmul.f32 -1.442695, %v1934_v6  ;;  %v2159_v6 = vld [vmem:[#allocation9 + $0x2b8] sm:$0xff]  ;;  %v2094_v1 = vld [vmem:[#allocation9 + $0xb0] sm:$0xff] }
0x2427   :  { %3307 = vpow2.f32 %v2757_v2  ;;  %v2093_v2 = vld [vmem:[#allocation9 + $0xa8] sm:$0xff] }
0x2432   :  { %v3306_v9 = vpop.eup %3305 }
0x2433   :  { %1944 = vrot.lane.b32.xlu0 %v3306_v9, %s3483_s3  ;;  %v2158_v9 = vld [vmem:[#allocation9 + $0x2b0] sm:$0xff] }
0x2434   :  { %v3308_v3 = vpop.eup %3307 }
0x2435   :  { %v1938_v10 = vadd.f32 1.0, %v3308_v3  ;;  %v2157_v3 = vld [vmem:[#allocation9 + $0x2a8] sm:$0xff] }
0x2437   :  { %3309 = vrcp.f32 %v1938_v10  ;;  %v2092_v10 = vld [vmem:[#allocation9 + $0xa0] sm:$0xff] }
0x2444   :  { %v3310_v5 = vpop.eup %3309 }
0x2445   :  { %v1942_v8 = vmul.f32 %v3310_v5, %v1852_v48  ;;  %v2098_v48 = vld [vmem:[#allocation9 + $0xd0] sm:$0xff] }
0x24a5   :  { %v1945_v7 = vpop.permute.xlu0 %1944 }
0x24a6   :  { %v1947_v23 = vmul.f32 %v3310_v5, %v1945_v7  ;;  %v2091_v7 = vld [vmem:[#allocation9 + $0x98] sm:$0xff] }
0x24a8   :  { %1949 = vrot.lane.b32.xlu1 %v1947_v23, %s3484_s5  ;;  %v2155_v23 = vld [vmem:[#allocation9 + $0x298] sm:$0xff] }
0x251a   :  { %v1950_v11 = vpop.permute.xlu1 %1949 }
0x251b   :  { %v1952_v51 = vadd.f32 %v1950_v11, %v1942_v8  ;;  %v2090_v8 = vld [vmem:[#allocation9 + $0x90] sm:$0xff] }
0x251c   :  { %v2154_v11 = vld [vmem:[#allocation9 + $0x290] sm:$0xff] }
0x251d   :  { %3311 = vtanh.f32 %v1952_v51 }
0x252a   :  { %v3312_v12 = vpop.eup %3311 }
0x252b   :  { %1955 = vrot.lane.b32.xlu0 %v3312_v12, %s3483_s3  ;;  %v2153_v12 = vld [vmem:[#allocation9 + $0x288] sm:$0xff] }
0x259d   :  { %v1956_v13 = vpop.permute.xlu0 %1955 }
0x259e   :  { %v1958_v14 = vmul.f32 %v3310_v5, %v1956_v13  ;;  %v2156_v5 = vld [vmem:[#allocation9 + $0x2a0] sm:$0xff] }
0x259f   :  { %v2088_v13 = vld [vmem:[#allocation9 + $0x80] sm:$0xff] }
0x25a0   :  { %1960 = vrot.lane.b32.xlu1 %v1958_v14, %s3484_s5  ;;  %v2152_v14 = vld [vmem:[#allocation9 + $0x280] sm:$0xff] }
0x2612   :  { %v1961_v15 = vpop.permute.xlu1 %1960 }
0x2613   :  { %3130 = vmatmul.mubr.msk.f32.vlgmr.msra.gmra.mxu1 %vm287_vm3, %v1961_v15  ;;  %v2087_v15 = vld [vmem:[#allocation9 + $0x78] sm:$0xff] }
0x2614   :  { %3140 = vmatprep.mubr.msk.f32.mxu1 %vm3482_vm0, %v3481_v0  ;;  %3133 = vmatpush3.msra.mxu1 %v2070_v35  ;;  %v2143_v35 = vld [vmem:[#allocation9 + $0x238] sm:$0xff] }
0x2615   :  { %3134 = vmatprep.subr.mxu1 %v3481_v0 }
0x2616   :  { %3135 = vmatpush3.msra.mxu1 %v2067_v38  ;;  %v2077_v38 = vld [vmem:[#allocation9 + $0x28] sm:$0xff] }
0x2617   :  { %3136 = vmatprep.subr.mxu1 %v3481_v0 }
0x2618   :  { %3137 = vmatpush3.msra.mxu1 %v2064_v40  ;;  %v2076_v40 = vld [vmem:[#allocation9 + $0x20] sm:$0xff] }
0x2619   :  { %3138 = vmatprep.subr.mxu1 %v3481_v0 }
0x261a   :  { %3139 = vmatpush3.msra.mxu1 %v2061_v45  ;;  %v2073_v45 = vld [vmem:[#allocation9 + $0x8] sm:$0xff] }
0x261b   :  { %2466 = vmatprep.subr.mxu1 %v2167_v54  ;;  %v2131_v54 = vld [vmem:[#allocation9 + $0x1d8] sm:$0xff] }
0x26d3   :  { %v2030_v17 = vpop.f32.mrf.mxu1 }
0x26d4   :  { %v2034_v18 = vadd.f32 %v2030_v17, %v1261_v16  ;;  %v2151_v16 = vld [vmem:[#allocation9 + $0x278] sm:$0xff]  ;;  %v2086_v17 = vld [vmem:[#allocation9 + $0x70] sm:$0xff] }
0x26d5   :  { %v3131_v20 = vpop.f32.mrf.mxu1 }
0x26d6   :  { %3313 = vtanh.f32 %v2034_v18  ;;  %v2759_v22 = vmul.f32 -1.442695, %v2034_v18  ;;  %v2150_v18 = vld [vmem:[#allocation9 + $0x270] sm:$0xff]  ;;  %v2085_v20 = vld [vmem:[#allocation9 + $0x68] sm:$0xff] }
0x26d8   :  { %3315 = vpow2.f32 %v2759_v22  ;;  %v2084_v22 = vld [vmem:[#allocation9 + $0x60] sm:$0xff] }
0x26e3   :  { %v3314_v21 = vpop.eup %3313 }
0x26e4   :  { %2044 = vrot.lane.b32.xlu0 %v3314_v21, %s3483_s3  ;;  %v2149_v21 = vld [vmem:[#allocation9 + $0x268] sm:$0xff] }
0x26e5   :  { %v3316_v24 = vpop.eup %3315 }
0x26e6   :  { %v2038_v26 = vadd.f32 1.0, %v3316_v24  ;;  %v2148_v24 = vld [vmem:[#allocation9 + $0x260] sm:$0xff] }
0x26e8   :  { %3317 = vrcp.f32 %v2038_v26  ;;  %v2083_v26 = vld [vmem:[#allocation9 + $0x58] sm:$0xff] }
0x26f5   :  { %v3318_v28 = vpop.eup %3317 }
0x26f6   :  { %v2042_v32 = vmul.f32 %v3318_v28, %v1952_v51  ;;  %v2089_v51 = vld [vmem:[#allocation9 + $0x88] sm:$0xff] }
0x2756   :  { %v2045_v29 = vpop.permute.xlu0 %2044 }
0x2757   :  { %v2047_v31 = vmul.f32 %v3318_v28, %v2045_v29  ;;  %v2082_v29 = vld [vmem:[#allocation9 + $0x50] sm:$0xff] }
0x2759   :  { %2049 = vrot.lane.b32.xlu1 %v2047_v31, %s3484_s5  ;;  %v2146_v31 = vld [vmem:[#allocation9 + $0x250] sm:$0xff] }
0x27cb   :  { %v2050_v33 = vpop.permute.xlu1 %2049 }
0x27cc   :  { %v2052_v53 = vadd.f32 %v2050_v33, %v2042_v32  ;;  %v2081_v32 = vld [vmem:[#allocation9 + $0x48] sm:$0xff] }
0x27cd   :  { %v2145_v33 = vld [vmem:[#allocation9 + $0x248] sm:$0xff] }
0x27ce   :  { %3319 = vtanh.f32 %v2052_v53  ;;  %v2080_v53 = vld [vmem:[#allocation9 + $0x40] sm:$0xff] }
0x27db   :  { %v3320_v47 = vpop.eup %3319 }
0x27dc   :  { %2055 = vrot.lane.b32.xlu0 %v3320_v47, %s3483_s3  ;;  %v2135_v47 = vld [vmem:[#allocation9 + $0x1f8] sm:$0xff] }
0x284e   :  { %v2056_v49 = vpop.permute.xlu0 %2055 }
0x284f   :  { %v2058_v52 = vmul.f32 %v3318_v28, %v2056_v49  ;;  %v2147_v28 = vld [vmem:[#allocation9 + $0x258] sm:$0xff]  ;;  %v2133_v49 = vld [vmem:[#allocation9 + $0x1e8] sm:$0xff] }
0x2851   :  { %2236 = vrot.lane.b32.xlu1 %v2058_v52, %s3484_s5  ;;  %v2132_v52 = vld [vmem:[#allocation9 + $0x1e0] sm:$0xff] }
0x28c3   :  { %v2237_v56 = vpop.permute.xlu1 %2236 }
0x28c4   :  { %2760 = vmatmul.mubr.msk.f32.vlgmr.msra.gmra.mxu0 %vm287_vm3, %v2237_v56  ;;  %3141 = vmatmul.mubr.msk.f32.vlgmr.msra.gmra.mxu1 %vm287_vm3, %v2237_v56  ;;  %v2128_v56 = vld [vmem:[#allocation9 + $0x1c0] sm:$0xff] }
0x28c5   :  { %2396 = vmatpush1.msra.mxu0 %v2102_v55  ;;  %2467 = vmatpush1.msra.mxu1 %v2166_v41  ;;  %v2130_v55 = vld [vmem:[#allocation9 + $0x1d0] sm:$0xff]  ;;  %v2129_v41 = vld [vmem:[#allocation9 + $0x1c8] sm:$0xff] }
0x28c6   :  { %2397 = vmatprep.subr.mxu0 %v2101_v42  ;;  %2468 = vmatprep.subr.mxu1 %v2165_v25  ;;  %v2127_v42 = vld [vmem:[#allocation9 + $0x1b8] sm:$0xff]  ;;  %v2126_v25 = vld [vmem:[#allocation9 + $0x1b0] sm:$0xff] }
0x28c7   :  { %2398 = vmatpush1.msra.mxu0 %v2100_v57  ;;  %2469 = vmatpush1.msra.mxu1 %v2164_v43  ;;  %v2125_v57 = vld [vmem:[#allocation9 + $0x1a8] sm:$0xff]  ;;  %v2124_v43 = vld [vmem:[#allocation9 + $0x1a0] sm:$0xff] }
0x28c8   :  { %2399 = vmatprep.subr.mxu0 %v2099_v58  ;;  %2470 = vmatprep.subr.mxu1 %v2163_v59  ;;  %v2123_v58 = vld [vmem:[#allocation9 + $0x198] sm:$0xff]  ;;  %v2122_v59 = vld [vmem:[#allocation9 + $0x190] sm:$0xff] }
0x28c9   :  { %2400 = vmatpush1.msra.mxu0 %v2098_v48  ;;  %2471 = vmatpush1.msra.mxu1 %v2162_v27  ;;  %v2121_v48 = vld [vmem:[#allocation9 + $0x188] sm:$0xff]  ;;  %v2120_v27 = vld [vmem:[#allocation9 + $0x180] sm:$0xff] }
0x28ca   :  { %2401 = vmatprep.subr.mxu0 %v2097_v60  ;;  %2472 = vmatprep.subr.mxu1 %v2161_v4  ;;  %v2119_v60 = vld [vmem:[#allocation9 + $0x178] sm:$0xff]  ;;  %v2118_v4 = vld [vmem:[#allocation9 + $0x170] sm:$0xff] }
0x28cb   :  { %2402 = vmatpush1.msra.mxu0 %v2096_v61  ;;  %2473 = vmatpush1.msra.mxu1 %v2160_v62  ;;  %v2117_v61 = vld [vmem:[#allocation9 + $0x168] sm:$0xff]  ;;  %v2116_v62 = vld [vmem:[#allocation9 + $0x160] sm:$0xff] }
0x28cc   :  { %2403 = vmatprep.subr.mxu0 %v2095_v63  ;;  %2474 = vmatprep.subr.mxu1 %v2159_v6  ;;  %v2115_v63 = vld [vmem:[#allocation9 + $0x158] sm:$0xff]  ;;  %v2114_v6 = vld [vmem:[#allocation9 + $0x150] sm:$0xff] }
0x28cd   :  { %2404 = vmatpush1.msra.mxu0 %v2094_v1  ;;  %2475 = vmatpush1.msra.mxu1 %v2158_v9  ;;  %v2113_v1 = vld [vmem:[#allocation9 + $0x148] sm:$0xff]  ;;  %v2112_v9 = vld [vmem:[#allocation9 + $0x140] sm:$0xff] }
0x28ce   :  { %2405 = vmatprep.subr.mxu0 %v2093_v2  ;;  %2476 = vmatprep.subr.mxu1 %v2157_v3  ;;  %v2111_v2 = vld [vmem:[#allocation9 + $0x138] sm:$0xff]  ;;  %v2140_v3 = vld [vmem:[#allocation9 + $0x220] sm:$0xff] }
0x28cf   :  { %2406 = vmatpush1.msra.mxu0 %v2092_v10  ;;  %2477 = vmatpush1.msra.mxu1 %v2156_v5  ;;  %v2110_v10 = vld [vmem:[#allocation9 + $0x130] sm:$0xff]  ;;  %v2139_v5 = vld [vmem:[#allocation9 + $0x218] sm:$0xff] }
0x28d0   :  { %2407 = vmatprep.subr.mxu0 %v2091_v7  ;;  %2478 = vmatprep.subr.mxu1 %v2155_v23  ;;  %v2109_v7 = vld [vmem:[#allocation9 + $0x128] sm:$0xff]  ;;  %v2138_v23 = vld [vmem:[#allocation9 + $0x210] sm:$0xff] }
0x28d1   :  { %2408 = vmatpush1.msra.mxu0 %v2090_v8  ;;  %2479 = vmatpush1.msra.mxu1 %v2154_v11  ;;  %v2108_v8 = vld [vmem:[#allocation9 + $0x120] sm:$0xff]  ;;  %v2137_v11 = vld [vmem:[#allocation9 + $0x208] sm:$0xff] }
0x28d2   :  { %2409 = vmatprep.subr.mxu0 %v2089_v51  ;;  %2480 = vmatprep.subr.mxu1 %v2153_v12  ;;  %v2107_v51 = vld [vmem:[#allocation9 + $0x118] sm:$0xff]  ;;  %v2136_v12 = vld [vmem:[#allocation9 + $0x200] sm:$0xff] }
0x28d3   :  { %2410 = vmatpush1.msra.mxu0 %v2088_v13  ;;  %2481 = vmatpush1.msra.mxu1 %v2152_v14  ;;  %v2106_v13 = vld [vmem:[#allocation9 + $0x110] sm:$0xff]  ;;  %v2105_v14 = vld [vmem:[#allocation9 + $0x108] sm:$0xff] }
0x28d4   :  { %2411 = vmatprep.subr.mxu0 %v2087_v15  ;;  %2482 = vmatprep.subr.mxu1 %v2151_v16  ;;  %v2104_v15 = vld [vmem:[#allocation9 + $0x100] sm:$0xff]  ;;  %v2200_v16 = vld [vmem:[#allocation11 + $0xf8] sm:$0xff] }
0x28d5   :  { %2412 = vmatpush1.msra.mxu0 %v2086_v17  ;;  %2483 = vmatpush1.msra.mxu1 %v2150_v18  ;;  %v2220_v17 = vlaneseq }
0x28d6   :  { %2413 = vmatprep.subr.mxu0 %v2085_v20  ;;  %2484 = vmatprep.subr.mxu1 %v2149_v21  ;;  %v2071_v21 = vld [vmem:[%s4059_s8] sm:$0x7] }
0x28d7   :  { %2414 = vmatpush1.msra.mxu0 %v2084_v22  ;;  %2485 = vmatpush1.msra.mxu1 %v2148_v24  ;;  %v4006_v18 = vshrl.u32 %v2220_v17, 7 }
0x28d8   :  { %2415 = vmatprep.subr.mxu0 %v2083_v26  ;;  %2486 = vmatprep.subr.mxu1 %v2147_v28 }
0x28d9   :  { %2416 = vmatpush1.msra.mxu0 %v2082_v29  ;;  %2487 = vmatpush1.msra.mxu1 %v2146_v31  ;;  %v2230_v20 = vsub.s32 2, %v4006_v18  ;;  %v2222_v22 = vsub.s32 0, %v4006_v18  ;;  %v2226_v24 = vsub.s32 1, %v4006_v18  ;;  %v2204_v18 = vld [vmem:[#allocation12 + $0x10] sm:$0xff] }
0x28da   :  { %2417 = vmatprep.subr.mxu0 %v2081_v32  ;;  %2488 = vmatprep.subr.mxu1 %v2145_v33 }
0x28db   :  { %2418 = vmatpush1.msra.mxu0 %v2080_v53  ;;  %2489 = vmatpush1.msra.mxu1 %v2144_v50  ;;  %v2231_v26 = vrot.slane %v2071_v21, %v2230_v20  ;;  %v2223_v28 = vrot.slane %v2071_v21, %v2222_v22  ;;  %v2227_v29 = vrot.slane %v2071_v21, %v2226_v24 }
0x28dc   :  { %2419 = vmatprep.subr.mxu0 %v2079_v34  ;;  %2490 = vmatprep.subr.mxu1 %v2143_v35 }
0x28dd   :  { %2420 = vmatpush1.msra.mxu0 %v2078_v36  ;;  %2491 = vmatpush1.msra.mxu1 %v2142_v37  ;;  %v2184_v37 = vld [vmem:[#allocation11 + $0x78] sm:$0xff] }
0x28de   :  { %2421 = vmatprep.subr.mxu0 %v2077_v38  ;;  %2492 = vmatprep.subr.mxu1 %v2141_v39  ;;  %v2199_v38 = vld [vmem:[#allocation11 + $0xf0] sm:$0xff] }
0x28df   :  { %2422 = vmatpush1.msra.mxu0 %v2076_v40  ;;  %2530 = vmatprep.mubr.f32.mxu1 %v3481_v0  ;;  %v2183_v40 = vld [vmem:[#allocation11 + $0x70] sm:$0xff] }
0x28e0   :  { %2423 = vmatprep.subr.mxu0 %v2075_v30  ;;  %2493 = vmatpush1.msra.mxu1 %v2140_v3  ;;  %v2217_v3 = vld [vmem:[#allocation12 + $0x78] sm:$0xff] }
0x28e1   :  { %2424 = vmatpush1.msra.mxu0 %v2074_v44  ;;  %2494 = vmatprep.subr.mxu1 %v2139_v5  ;;  %v2198_v44 = vld [vmem:[#allocation11 + $0xe8] sm:$0xff] }
0x28e2   :  { %2425 = vmatprep.subr.mxu0 %v2073_v45  ;;  %2495 = vmatpush1.msra.mxu1 %v2138_v23  ;;  %v2182_v45 = vld [vmem:[#allocation11 + $0x68] sm:$0xff]  ;;  %v2213_v23 = vld [vmem:[#allocation12 + $0x58] sm:$0xff] }
0x28e3   :  { %2426 = vmatpush1.msra.mxu0 %v2072_v46  ;;  %2496 = vmatprep.subr.mxu1 %v2137_v11  ;;  %v2197_v46 = vld [vmem:[#allocation11 + $0xe0] sm:$0xff]  ;;  %v2215_v5 = vld [vmem:[#allocation12 + $0x68] sm:$0xff] }
0x28e4   :  { %2427 = vmatprep.subr.mxu0 %v2135_v47  ;;  %2497 = vmatpush1.msra.mxu1 %v2136_v12  ;;  %v2181_v47 = vld [vmem:[#allocation11 + $0x60] sm:$0xff]  ;;  %v2211_v11 = vld [vmem:[#allocation12 + $0x48] sm:$0xff]  ;;  %v2209_v12 = vld [vmem:[#allocation12 + $0x38] sm:$0xff] }
0x28e5   :  { %2428 = vmatpush2.msra.mxu0 %v2134_v19  ;;  %2870 = vmatprep.subr.mxu1 %v2200_v16  ;;  %v2196_v19 = vld [vmem:[#allocation11 + $0xd8] sm:$0xff] }
0x28e6   :  { %2429 = vmatprep.subr.mxu0 %v2133_v49  ;;  %v2180_v49 = vld [vmem:[#allocation11 + $0x58] sm:$0xff] }
0x28e7   :  { %2430 = vmatpush2.msra.mxu0 %v2132_v52  ;;  %v2195_v52 = vld [vmem:[#allocation11 + $0xd0] sm:$0xff] }
0x28e8   :  { %2431 = vmatprep.subr.mxu0 %v2131_v54  ;;  %v2179_v54 = vld [vmem:[#allocation11 + $0x50] sm:$0xff] }
0x28e9   :  { %2432 = vmatpush2.msra.mxu0 %v2130_v55  ;;  %v2194_v55 = vld [vmem:[#allocation11 + $0xc8] sm:$0xff] }
0x28ea   :  { %2433 = vmatprep.subr.mxu0 %v2129_v41  ;;  %v2178_v41 = vld [vmem:[#allocation11 + $0x48] sm:$0xff] }
0x28eb   :  { %2434 = vmatpush2.msra.mxu0 %v2128_v56  ;;  %v2193_v56 = vld [vmem:[#allocation11 + $0xc0] sm:$0xff] }
0x28ec   :  { %2435 = vmatprep.subr.mxu0 %v2127_v42  ;;  %v2177_v42 = vld [vmem:[#allocation11 + $0x40] sm:$0xff] }
0x28ed   :  { %2436 = vmatpush2.msra.mxu0 %v2126_v25  ;;  %v2192_v25 = vld [vmem:[#allocation11 + $0xb8] sm:$0xff] }
0x28ee   :  { %2437 = vmatprep.subr.mxu0 %v2125_v57  ;;  %v2176_v57 = vld [vmem:[#allocation11 + $0x38] sm:$0xff] }
0x28ef   :  { %2438 = vmatpush2.msra.mxu0 %v2124_v43  ;;  %v2191_v43 = vld [vmem:[#allocation11 + $0xb0] sm:$0xff] }
0x28f0   :  { %2439 = vmatprep.subr.mxu0 %v2123_v58  ;;  %v2175_v58 = vld [vmem:[#allocation11 + $0x30] sm:$0xff] }
0x28f1   :  { %2440 = vmatpush2.msra.mxu0 %v2122_v59  ;;  %v2190_v59 = vld [vmem:[#allocation11 + $0xa8] sm:$0xff] }
0x28f2   :  { %2441 = vmatprep.subr.mxu0 %v2121_v48  ;;  %v2174_v48 = vld [vmem:[#allocation11 + $0x28] sm:$0xff] }
0x28f3   :  { %2442 = vmatpush2.msra.mxu0 %v2120_v27  ;;  %v2189_v27 = vld [vmem:[#allocation11 + $0xa0] sm:$0xff] }
0x28f4   :  { %2443 = vmatprep.subr.mxu0 %v2119_v60  ;;  %v2173_v60 = vld [vmem:[#allocation11 + $0x20] sm:$0xff] }
0x28f5   :  { %2444 = vmatpush2.msra.mxu0 %v2118_v4  ;;  %v2188_v4 = vld [vmem:[#allocation11 + $0x98] sm:$0xff] }
0x28f6   :  { %2445 = vmatprep.subr.mxu0 %v2117_v61  ;;  %v2172_v61 = vld [vmem:[#allocation11 + $0x18] sm:$0xff] }
0x28f7   :  { %2446 = vmatpush2.msra.mxu0 %v2116_v62  ;;  %v2187_v62 = vld [vmem:[#allocation11 + $0x90] sm:$0xff] }
0x28f8   :  { %2447 = vmatprep.subr.mxu0 %v2115_v63  ;;  %v2171_v63 = vld [vmem:[#allocation11 + $0x10] sm:$0xff] }
0x28f9   :  { %2448 = vmatpush2.msra.mxu0 %v2114_v6  ;;  %v2186_v6 = vld [vmem:[#allocation11 + $0x88] sm:$0xff] }
0x28fa   :  { %2449 = vmatprep.subr.mxu0 %v2113_v1  ;;  %v2170_v1 = vld [vmem:[#allocation11 + $0x8] sm:$0xff] }
0x28fb   :  { %2450 = vmatpush2.msra.mxu0 %v2112_v9  ;;  %v2185_v9 = vld [vmem:[#allocation11 + $0x80] sm:$0xff] }
0x28fc   :  { %2451 = vmatprep.subr.mxu0 %v2111_v2  ;;  %v2169_v2 = vld [vmem:[#allocation11] sm:$0xff] }
0x28fd   :  { %2452 = vmatpush2.msra.mxu0 %v2110_v10  ;;  %v2216_v10 = vld [vmem:[#allocation12 + $0x70] sm:$0xff] }
0x28fe   :  { %2453 = vmatprep.subr.mxu0 %v2109_v7  ;;  %v2214_v7 = vld [vmem:[#allocation12 + $0x60] sm:$0xff] }
0x28ff   :  { %2454 = vmatpush2.msra.mxu0 %v2108_v8  ;;  %v2212_v8 = vld [vmem:[#allocation12 + $0x50] sm:$0xff] }
0x2900   :  { %2455 = vmatprep.subr.mxu0 %v2107_v51  ;;  %v2210_v51 = vld [vmem:[#allocation12 + $0x40] sm:$0xff] }
0x2901   :  { %2456 = vmatpush2.msra.mxu0 %v2106_v13  ;;  %v2208_v13 = vld [vmem:[#allocation12 + $0x30] sm:$0xff] }
0x2902   :  { %2457 = vmatprep.subr.mxu0 %v2105_v14  ;;  %v2207_v14 = vld [vmem:[#allocation12 + $0x28] sm:$0xff] }
0x2903   :  { %2458 = vmatpush2.msra.mxu0 %v2104_v15  ;;  %v2168_v15 = vld [vmem:[%s4061_s10] sm:$0x3] }
0x2904   :  { %3143 = vmatprep.subr.mxu0 %v3481_v0  ;;  %v2388_v16 = vrot.slane %v2168_v15, %v2222_v22  ;;  %v2392_v17 = vrot.slane %v2168_v15, %v2226_v24  ;;  %v2205_v22 = vld [vmem:[#allocation12 + $0x18] sm:$0xff]  ;;  %v2203_v24 = vld [vmem:[#allocation12 + $0x8] sm:$0xff] }
0x2984   :  { %v2306_v31 = vpop.f32.mrf.mxu0  ;;  %v2377_v32 = vpop.f32.mrf.mxu1 }
0x2985   :  { %v2378_v33 = vadd.f32 %v2377_v32, %v2231_v26  ;;  %v2307_v53 = vadd.f32 %v2306_v31, %v2223_v28 }
0x2986   :  { %v2308_v50 = vpop.f32.mrf.mxu0  ;;  %v3142_v34 = vpop.f32.mrf.mxu1 }
0x2987   :  { %v2383_v35 = vmax.f32 %v2378_v33, 0.0  ;;  %v2309_v36 = vadd.f32 %v2308_v50, %v2227_v29  ;;  %v2381_v30 = vmax.f32 %v2307_v53, 0.0  ;;  %v2206_v34 = vld [vmem:[#allocation12 + $0x20] sm:$0xff] }
0x2989   :  { %v2382_v39 = vmax.f32 %v2309_v36, 0.0  ;;  %2531 = vmatmul.mubr.f32.vlgmr.msra.gmra.mxu1 %v2383_v35  ;;  %v2202_v35 = vld [vmem:[#allocation12] sm:$0xff] }
0x298a   :  { %2871 = vmatpush3.msra.mxu1 %v2184_v37  ;;  %v2762_v37 = vld [vmem:[%s4063_s12] ss:$0 sm:$0xff] }
0x298b   :  { %2459 = vmatprep.mubr.f32.mxu0 %v2382_v39  ;;  %2872 = vmatprep.subr.mxu1 %v2199_v38 }
0x298c   :  { %2460 = vmatmul.mubr.f32.vlgmr.msra.gmra.mxu0 %v2381_v30  ;;  %2873 = vmatpush3.msra.mxu1 %v2183_v40 }
0x298d   :  { %2874 = vmatprep.subr.mxu1 %v2198_v44  ;;  %3175 = vmatprep.mubr.msk.f32.mxu0 %vm3482_vm0, %v3481_v0  ;;  %v2763_v44 = vld [vmem:[%s4065_s14] ss:$0 sm:$0xff] }
0x298e   :  { %2875 = vmatpush3.msra.mxu1 %v2182_v45  ;;  %3144 = vmatpush3.msra.mxu0 %v2217_v3 }
0x298f   :  { %2876 = vmatprep.subr.mxu1 %v2197_v46  ;;  %3145 = vmatprep.subr.mxu0 %v3481_v0 }
0x2990   :  { %2877 = vmatpush3.msra.mxu1 %v2181_v47  ;;  %3146 = vmatpush3.msra.mxu0 %v2216_v10 }
0x2991   :  { %2878 = vmatprep.subr.mxu1 %v2196_v19  ;;  %3147 = vmatprep.subr.mxu0 %v3481_v0 }
0x2992   :  { %2879 = vmatpush3.msra.mxu1 %v2180_v49  ;;  %3148 = vmatpush3.msra.mxu0 %v2215_v5 }
0x2993   :  { %2880 = vmatprep.subr.mxu1 %v2195_v52  ;;  %3149 = vmatprep.subr.mxu0 %v3481_v0 }
0x2994   :  { %2881 = vmatpush3.msra.mxu1 %v2179_v54  ;;  %3150 = vmatpush3.msra.mxu0 %v2214_v7 }
0x2995   :  { %2882 = vmatprep.subr.mxu1 %v2194_v55  ;;  %3151 = vmatprep.subr.mxu0 %v3481_v0 }
0x2996   :  { %2883 = vmatpush3.msra.mxu1 %v2178_v41  ;;  %3152 = vmatpush3.msra.mxu0 %v2213_v23 }
0x2997   :  { %2884 = vmatprep.subr.mxu1 %v2193_v56  ;;  %3153 = vmatprep.subr.mxu0 %v3481_v0 }
0x2998   :  { %2885 = vmatpush3.msra.mxu1 %v2177_v42  ;;  %3154 = vmatpush3.msra.mxu0 %v2212_v8 }
0x2999   :  { %2886 = vmatprep.subr.mxu1 %v2192_v25  ;;  %3155 = vmatprep.subr.mxu0 %v3481_v0 }
0x299a   :  { %2887 = vmatpush3.msra.mxu1 %v2176_v57  ;;  %3156 = vmatpush3.msra.mxu0 %v2211_v11 }
0x299b   :  { %2888 = vmatprep.subr.mxu1 %v2191_v43  ;;  %3157 = vmatprep.subr.mxu0 %v3481_v0 }
0x299c   :  { %2889 = vmatpush3.msra.mxu1 %v2175_v58  ;;  %3158 = vmatpush3.msra.mxu0 %v2210_v51 }
0x299d   :  { %2890 = vmatprep.subr.mxu1 %v2190_v59  ;;  %3159 = vmatprep.subr.mxu0 %v3481_v0 }
0x299e   :  { %2891 = vmatpush3.msra.mxu1 %v2174_v48  ;;  %3160 = vmatpush3.msra.mxu0 %v2209_v12 }
0x299f   :  { %2892 = vmatprep.subr.mxu1 %v2189_v27  ;;  %3161 = vmatprep.subr.mxu0 %v3481_v0 }
0x29a0   :  { %2893 = vmatpush3.msra.mxu1 %v2173_v60  ;;  %3162 = vmatpush3.msra.mxu0 %v2208_v13 }
0x29a1   :  { %2894 = vmatprep.subr.mxu1 %v2188_v4  ;;  %3163 = vmatprep.subr.mxu0 %v3481_v0 }
0x29a2   :  { %2895 = vmatpush3.msra.mxu1 %v2172_v61  ;;  %3164 = vmatpush3.msra.mxu0 %v2207_v14 }
0x29a3   :  { %2896 = vmatprep.subr.mxu1 %v2187_v62  ;;  %3165 = vmatprep.subr.mxu0 %v3481_v0 }
0x29a4   :  { %2897 = vmatpush3.msra.mxu1 %v2171_v63  ;;  %3166 = vmatpush3.msra.mxu0 %v2206_v34 }
0x29a5   :  { %2898 = vmatprep.subr.mxu1 %v2186_v6  ;;  %3167 = vmatprep.subr.mxu0 %v3481_v0 }
0x29a6   :  { %2899 = vmatpush3.msra.mxu1 %v2170_v1  ;;  %3168 = vmatpush3.msra.mxu0 %v2205_v22 }
0x29a7   :  { %2900 = vmatprep.subr.mxu1 %v2185_v9  ;;  %3169 = vmatprep.subr.mxu0 %v3481_v0 }
0x29a8   :  { %2901 = vmatpush3.msra.mxu1 %v2169_v2  ;;  %3170 = vmatpush3.msra.mxu0 %v2204_v18 }
0x29a9   :  { %3171 = vmatprep.subr.mxu0 %v3481_v0 }
0x29aa   :  { %3172 = vmatpush3.msra.mxu0 %v2203_v24 }
0x29ab   :  { %3173 = vmatprep.subr.mxu0 %v3481_v0 }
0x29ac   :  { %3174 = vmatpush3.msra.mxu0 %v2202_v35 }
0x2a49   :  { %v2532_v20 = vpop.f32.mrf.mxu1 }
0x2a4b   :  { %v2534_v31 = vpop.f32.mrf.mxu1 }
0x2a4c   :  { %v2461_v21 = vpop.f32.mrf.mxu0 }
0x2a4d   :  { %v2462_v26 = vadd.f32 %v2461_v21, %v2388_v16 }
0x2a4e   :  { %v2463_v28 = vpop.f32.mrf.mxu0 }
0x2a4f   :  { %v2464_v29 = vadd.f32 %v2463_v28, %v2392_v17  ;;  %v2533_v32 = vadd.f32 %v2532_v20, %v2462_v26 }
0x2a51   :  { %v2535_v33 = vadd.f32 %v2534_v31, %v2464_v29  ;;  %v2537_v50 = vmax.f32 %v2533_v32, 0.0 }
0x2a53   :  { %v2538_v53 = vmax.f32 %v2535_v33, 0.0 }
0x2a55   :  { %2609 = vmatprep.mubr.f32.mxu1 %v2538_v53 }
0x2a56   :  { %2610 = vmatmul.mubr.f32.vlgmr.msra.gmra.mxu1 %v2537_v50 }
0x2b16   :  { %v2902_v36 = vpop.f32.mrf.mxu1 }
0x2b18   :  { %v2903_v38 = vpop.f32.mrf.mxu1 }
0x2b19   :  { %v2904_v39 = vadd.f32 %v2903_v38, %v2902_v36 }
0x2b1b   :  { %v2612_v40 = vadd.f32 %v2904_v39, %v2762_v37 }
0x2b1d   :  { %v2615_v30 = vmax.f32 %v2612_v40, 0.0 }
0x2b1f   :  { %3176 = vmatmul.mubr.f32.vlgmr.msra.gmra.mxu0 %v2615_v30 }
0x2bdf   :  { %v2688_v45 = vpop.f32.mrf.mxu0 }
0x2be0   :  { %v2689_v0 = vadd.f32 %v2763_v44, %v2688_v45 }
0x2be1   :  { %v3177_v46 = vpop.f32.mrf.mxu0 }
0x2be2   :  { %2692 = vst [vmem:[#allocation14] sm:$0xff] %v2689_v0 }
0x2be3   :  { %3452 = shalt.err (!%p3449_p6)
}
0x2be4   :  { %2702 = dma.vmem_to_hbm [thread:$0]  %s2700_s24, 128, %s4066_s15, [#allocation5]  }
0x2be5   :  { %3469 = dma.done.wait [#allocation5], 128  }
0x2be6   :  { %3470 = vsyncadd [#allocation5], 4294967168 }
0x2be7   :  { %2706 = vsyncpa [#allocation4], 1 }
0x2be8   :  { %2707 = vsyncpa [#allocation7], 1 }
0x2be9   :  { %2708 = vsyncpa [#allocation10], 1 }
0x2bea   :  { %2709 = vsyncpa [#allocation13], 1 }
0x2beb   :  { %2710 = vsyncpa [#allocation5], 1 }

</bundles_post_ra>
